<compile_context>
chip_gen: v7x
topology: tpu7x:2x2x1
jax: 0.10.0
libtpu: 0.0.40
codegen_flags: <defaults>
</compile_context>

<pallas_src>
import jax
import jax.numpy as jnp
from jax.experimental import pallas as pl
from jax.experimental.pallas import tpu as pltpu

LANE_PAD = 128  # pad num_classes up to a full lane group for dense stores


def smallnn_kernel(x_ref, w1_ref, b1_ref, w2_ref, b2_ref, w3_ref, b3_ref, o_ref):
    # Cast the streamed activations to bf16 in-kernel (hides under the MXU);
    # explicit cast keeps Mosaic on the bf16 MXU path (no silent fp32 promote).
    x = x_ref[...].astype(jnp.bfloat16)

    # Layer 1: Linear(dim_in -> k) + ReLU   (Dropout = identity in eval mode)
    h1 = jnp.dot(x, w1_ref[...], preferred_element_type=jnp.float32)
    h1 = jnp.maximum(h1 + b1_ref[...], 0.0)          # fp32 epilogue (VPU)

    # Layer 2: Linear(k -> k) + ReLU        (Dropout = identity in eval mode)
    h2 = jnp.dot(h1.astype(jnp.bfloat16), w2_ref[...],
                 preferred_element_type=jnp.float32)
    h2 = jnp.maximum(h2 + b2_ref[...], 0.0)

    # Layer 3: Linear(k -> num_classes_padded)
    out = jnp.dot(h2.astype(jnp.bfloat16), w3_ref[...],
                  preferred_element_type=jnp.float32)
    o_ref[...] = (out + b3_ref[...]).astype(o_ref.dtype)


def prepare_kernel_params(params, num_classes):
    """Canonical fp32 params -> kernel format: bf16 weights, lane-padded layer 3."""
    k = params["w3"].shape[0]
    w3_pad = jnp.zeros((k, LANE_PAD), jnp.float32).at[:, :num_classes].set(params["w3"])
    b3_pad = jnp.zeros((1, LANE_PAD), jnp.float32).at[:, :num_classes].set(params["b3"])
    return {
        "w1": params["w1"].astype(jnp.bfloat16),
        "b1": params["b1"].astype(jnp.float32),
        "w2": params["w2"].astype(jnp.bfloat16),
        "b2": params["b2"].astype(jnp.float32),
        "w3": w3_pad.astype(jnp.bfloat16),
        "b3": b3_pad,
    }


def _round_up(x, m):
    return ((x + m - 1) // m) * m


def _choose_batch_tile(B, max_block_b):
    """Pick the batch tile: whole (8-aligned) batch when small; otherwise a
    256-aligned tile capped at max_block_b, preferring >= 2 grid steps (v7x dual
    TensorCore) and a tile that divides the batch (avoids the pad copy)."""
    b8 = _round_up(max(B, 8), 8)
    if b8 <= 256:
        return b8
    tb = min(_round_up(pl.cdiv(b8, 2), 256), _round_up(max_block_b, 256))
    # Prefer a 256-multiple tile that divides the 8-aligned batch exactly.
    for cand in range(tb, 255, -256):
        if b8 % cand == 0:
            return cand
    return tb


def smallnn_forward(x, kparams, num_classes, *, max_block_b=1024,
                    out_dtype=jnp.float32):
    """x: [B, dim_in] float32 (or bfloat16). kparams: prepare_kernel_params output."""
    B, dim_in = x.shape
    k = kparams["w1"].shape[1]

    tb = _choose_batch_tile(B, max_block_b)
    b_pad = _round_up(B, tb)
    if b_pad != B:
        # TODO(synk): replace with a masked tail block to avoid this HBM pad copy.
        x = jnp.pad(x, ((0, b_pad - B), (0, 0)))
    nb = b_pad // tb

    x_bytes = int(jnp.dtype(x.dtype).itemsize)
    out_bytes = int(jnp.dtype(out_dtype).itemsize)
    weight_bytes = 2 * (dim_in * k + k * k + k * LANE_PAD) + 4 * (2 * k + LANE_PAD)
    cost = pl.CostEstimate(
        flops=2 * b_pad * (dim_in * k + k * k + k * LANE_PAD),
        transcendentals=0,
        bytes_accessed=b_pad * dim_in * x_bytes + weight_bytes
                       + b_pad * LANE_PAD * out_bytes,
    )

    out_padded = pl.pallas_call(
        smallnn_kernel,
        out_shape=jax.ShapeDtypeStruct((b_pad, LANE_PAD), out_dtype),
        grid=(nb,),
        in_specs=[
            pl.BlockSpec((tb, dim_in), lambda i: (i, 0)),       # x   (streams)
            pl.BlockSpec((dim_in, k), lambda i: (0, 0)),        # w1  (resident)
            pl.BlockSpec((1, k), lambda i: (0, 0)),             # b1
            pl.BlockSpec((k, k), lambda i: (0, 0)),             # w2  (resident)
            pl.BlockSpec((1, k), lambda i: (0, 0)),             # b2
            pl.BlockSpec((k, LANE_PAD), lambda i: (0, 0)),      # w3  (resident)
            pl.BlockSpec((1, LANE_PAD), lambda i: (0, 0)),      # b3
        ],
        out_specs=pl.BlockSpec((tb, LANE_PAD), lambda i: (i, 0)),
        compiler_params=pltpu.CompilerParams(
            dimension_semantics=("parallel",)
        ),
        cost_estimate=cost,
    )(x, kparams["w1"], kparams["b1"], kparams["w2"], kparams["b2"],
      kparams["w3"], kparams["b3"])

    return out_padded[:B, :num_classes]


def init_params(key, dim_in=768, k=512, num_classes=4):
    """Deterministic init mimicking PyTorch nn.Linear default (uniform +/- 1/sqrt(fan_in))."""
    ks = jax.random.split(key, 6)

    def linear(wkey, bkey, fan_in, fan_out):
        bound = 1.0 / jnp.sqrt(jnp.float32(fan_in))
        w = jax.random.uniform(wkey, (fan_in, fan_out), jnp.float32, -bound, bound)
        b = jax.random.uniform(bkey, (1, fan_out), jnp.float32, -bound, bound)
        return w, b

    w1, b1 = linear(ks[0], ks[1], dim_in, k)
    w2, b2 = linear(ks[2], ks[3], k, k)
    w3, b3 = linear(ks[4], ks[5], k, num_classes)
    return {"w1": w1, "b1": b1, "w2": w2, "b2": b2, "w3": w3, "b3": b3}


def reference_forward_fp32(x, p):
    h1 = jnp.maximum(x @ p["w1"] + p["b1"], 0.0)
    h2 = jnp.maximum(h1 @ p["w2"] + p["b2"], 0.0)
    return h2 @ p["w3"] + p["b3"]


def reference_forward_bf16(x, p):
    """Reference that mirrors the kernel's bf16-operand / fp32-accumulate path."""
    bf = lambda a: a.astype(jnp.bfloat16).astype(jnp.float32)
    h1 = jnp.maximum(bf(x) @ bf(p["w1"]) + p["b1"], 0.0)
    h2 = jnp.maximum(bf(h1) @ bf(p["w2"]) + p["b2"], 0.0)
    return bf(h2) @ bf(p["w3"]) + p["b3"]


if __name__ == "__main__":
    key = jax.random.PRNGKey(0)
    pkey, xkey, xkey2 = jax.random.split(key, 3)

    B, dim_in, k, num_classes = 8, 768, 512, 4
    params = init_params(pkey, dim_in=dim_in, k=k, num_classes=num_classes)
    kparams = prepare_kernel_params(params, num_classes)

    # Small-batch path (single whole-batch tile, grid=(1,)).
    x = jax.random.normal(xkey, (B, dim_in), jnp.float32)
    out = smallnn_forward(x, kparams, num_classes)
    out = jax.block_until_ready(out)
    assert out.shape == (B, num_classes), out.shape

    ref_bf16 = reference_forward_bf16(x, params)
    assert jnp.allclose(out, ref_bf16, atol=5e-3, rtol=5e-3), "mismatch vs bf16 reference"
    ref_fp32 = reference_forward_fp32(x, params)
    assert jnp.allclose(out, ref_fp32, atol=5e-2, rtol=5e-2), "mismatch vs fp32 reference"

    # Multi-tile path (256-aligned tiles, >=2 grid steps, ragged-batch pad).
    B2 = 300
    x2 = jax.random.normal(xkey2, (B2, dim_in), jnp.float32)
    out2 = jax.block_until_ready(smallnn_forward(x2, kparams, num_classes))
    assert out2.shape == (B2, num_classes), out2.shape
    ref2 = reference_forward_bf16(x2, params)
    assert jnp.allclose(out2, ref2, atol=5e-3, rtol=5e-3), "mismatch (multi-tile)"

    print("KERNEL_OK")
</pallas_src>

<mosaic_0001>
module attributes {stable_mosaic.version = 11 : i64} {
  func.func @smallnn_kernel(%arg0: i32, %arg1: memref<8x768xf32, #tpu.memory_space<vmem>>, %arg2: memref<768x512xbf16, #tpu.memory_space<vmem>>, %arg3: memref<1x512xf32, #tpu.memory_space<vmem>>, %arg4: memref<512x512xbf16, #tpu.memory_space<vmem>>, %arg5: memref<1x512xf32, #tpu.memory_space<vmem>>, %arg6: memref<512x128xbf16, #tpu.memory_space<vmem>>, %arg7: memref<1x128xf32, #tpu.memory_space<vmem>>, %arg8: memref<8x128xf32, #tpu.memory_space<vmem>>) attributes {dimension_semantics = [#tpu.dimension_semantics<parallel>], iteration_bounds = array<i64: 1>, scalar_prefetch = 0 : i64, scratch_operands = 0 : i64, tpu.core_type = #tpu.core_type<tc>, window_params = [{transform_indices = @transform_0, window_bounds = array<i64: 8, 768>}, {pipeline_mode = #tpu.pipeline_mode<synchronous>, transform_indices = @transform_1, window_bounds = array<i64: 768, 512>}, {pipeline_mode = #tpu.pipeline_mode<synchronous>, transform_indices = @transform_2, window_bounds = array<i64: 1, 512>}, {pipeline_mode = #tpu.pipeline_mode<synchronous>, transform_indices = @transform_3, window_bounds = array<i64: 512, 512>}, {pipeline_mode = #tpu.pipeline_mode<synchronous>, transform_indices = @transform_4, window_bounds = array<i64: 1, 512>}, {pipeline_mode = #tpu.pipeline_mode<synchronous>, transform_indices = @transform_5, window_bounds = array<i64: 512, 128>}, {pipeline_mode = #tpu.pipeline_mode<synchronous>, transform_indices = @transform_6, window_bounds = array<i64: 1, 128>}, {transform_indices = @transform_7, window_bounds = array<i64: 8, 128>}]} {
    %c0 = arith.constant 0 : index
    %c0_0 = arith.constant 0 : index
    %0 = vector.load %arg1[%c0, %c0_0] : memref<8x768xf32, #tpu.memory_space<vmem>>, vector<8x768xf32>
    %1 = arith.truncf %0 : vector<8x768xf32> to vector<8x768xbf16>
    %c0_1 = arith.constant 0 : index
    %c0_2 = arith.constant 0 : index
    %2 = vector.load %arg2[%c0_1, %c0_2] : memref<768x512xbf16, #tpu.memory_space<vmem>>, vector<768x512xbf16>
    %cst = arith.constant dense<0.000000e+00> : vector<8x512xf32>
    %3 = tpu.matmul %1, %2, %cst {dimension_numbers = #tpu.dot_dimension_numbers<[1], [0], [0], [1], [0, 0, 1, 1], [], []>} : vector<8x768xbf16>, vector<768x512xbf16>, vector<8x512xf32> -> vector<8x512xf32>
    %c0_3 = arith.constant 0 : index
    %c0_4 = arith.constant 0 : index
    %4 = vector.load %arg3[%c0_3, %c0_4] : memref<1x512xf32, #tpu.memory_space<vmem>>, vector<1x512xf32>
    %5 = vector.broadcast %4 : vector<1x512xf32> to vector<8x512xf32>
    %6 = arith.addf %3, %5 : vector<8x512xf32>
    %cst_5 = arith.constant 0.000000e+00 : f32
    %7 = vector.broadcast %cst_5 : f32 to vector<8x512xf32>
    %8 = arith.maximumf %6, %7 : vector<8x512xf32>
    %9 = arith.truncf %8 : vector<8x512xf32> to vector<8x512xbf16>
    %c0_6 = arith.constant 0 : index
    %c0_7 = arith.constant 0 : index
    %10 = vector.load %arg4[%c0_6, %c0_7] : memref<512x512xbf16, #tpu.memory_space<vmem>>, vector<512x512xbf16>
    %cst_8 = arith.constant dense<0.000000e+00> : vector<8x512xf32>
    %11 = tpu.matmul %9, %10, %cst_8 {dimension_numbers = #tpu.dot_dimension_numbers<[1], [0], [0], [1], [0, 0, 1, 1], [], []>} : vector<8x512xbf16>, vector<512x512xbf16>, vector<8x512xf32> -> vector<8x512xf32>
    %c0_9 = arith.constant 0 : index
    %c0_10 = arith.constant 0 : index
    %12 = vector.load %arg5[%c0_9, %c0_10] : memref<1x512xf32, #tpu.memory_space<vmem>>, vector<1x512xf32>
    %13 = vector.broadcast %12 : vector<1x512xf32> to vector<8x512xf32>
    %14 = arith.addf %11, %13 : vector<8x512xf32>
    %cst_11 = arith.constant 0.000000e+00 : f32
    %15 = vector.broadcast %cst_11 : f32 to vector<8x512xf32>
    %16 = arith.maximumf %14, %15 : vector<8x512xf32>
    %17 = arith.truncf %16 : vector<8x512xf32> to vector<8x512xbf16>
    %c0_12 = arith.constant 0 : index
    %c0_13 = arith.constant 0 : index
    %18 = vector.load %arg6[%c0_12, %c0_13] : memref<512x128xbf16, #tpu.memory_space<vmem>>, vector<512x128xbf16>
    %cst_14 = arith.constant dense<0.000000e+00> : vector<8x128xf32>
    %19 = tpu.matmul %17, %18, %cst_14 {dimension_numbers = #tpu.dot_dimension_numbers<[1], [0], [0], [1], [0, 0, 1, 1], [], []>} : vector<8x512xbf16>, vector<512x128xbf16>, vector<8x128xf32> -> vector<8x128xf32>
    %c0_15 = arith.constant 0 : index
    %c0_16 = arith.constant 0 : index
    %20 = vector.load %arg7[%c0_15, %c0_16] : memref<1x128xf32, #tpu.memory_space<vmem>>, vector<1x128xf32>
    %21 = vector.broadcast %20 : vector<1x128xf32> to vector<8x128xf32>
    %22 = arith.addf %19, %21 : vector<8x128xf32>
    %c0_17 = arith.constant 0 : index
    %c0_18 = arith.constant 0 : index
    %23 = vector.load %arg8[%c0_17, %c0_18] : memref<8x128xf32, #tpu.memory_space<vmem>>, vector<8x128xf32>
    tpu.vector_store %arg8[%c0_17, %c0_18], %22 {strides = array<i32>} : memref<8x128xf32, #tpu.memory_space<vmem>>, vector<8x128xf32>,
    return
  }
  func.func @transform_0(%arg0: i32) -> (i32, i32) {
    %c0_i32 = arith.constant 0 : i32
    %c0_i32_0 = arith.constant 0 : i32
    return %arg0, %c0_i32 : i32, i32
  }
  func.func @transform_1(%arg0: i32) -> (i32, i32) {
    %c0_i32 = arith.constant 0 : i32
    %c0_i32_0 = arith.constant 0 : i32
    %c0_i32_1 = arith.constant 0 : i32
    return %c0_i32, %c0_i32_0 : i32, i32
  }
  func.func @transform_2(%arg0: i32) -> (i32, i32) {
    %c0_i32 = arith.constant 0 : i32
    %c0_i32_0 = arith.constant 0 : i32
    %c0_i32_1 = arith.constant 0 : i32
    return %c0_i32, %c0_i32_0 : i32, i32
  }
  func.func @transform_3(%arg0: i32) -> (i32, i32) {
    %c0_i32 = arith.constant 0 : i32
    %c0_i32_0 = arith.constant 0 : i32
    %c0_i32_1 = arith.constant 0 : i32
    return %c0_i32, %c0_i32_0 : i32, i32
  }
  func.func @transform_4(%arg0: i32) -> (i32, i32) {
    %c0_i32 = arith.constant 0 : i32
    %c0_i32_0 = arith.constant 0 : i32
    %c0_i32_1 = arith.constant 0 : i32
    return %c0_i32, %c0_i32_0 : i32, i32
  }
  func.func @transform_5(%arg0: i32) -> (i32, i32) {
    %c0_i32 = arith.constant 0 : i32
    %c0_i32_0 = arith.constant 0 : i32
    %c0_i32_1 = arith.constant 0 : i32
    return %c0_i32, %c0_i32_0 : i32, i32
  }
  func.func @transform_6(%arg0: i32) -> (i32, i32) {
    %c0_i32 = arith.constant 0 : i32
    %c0_i32_0 = arith.constant 0 : i32
    %c0_i32_1 = arith.constant 0 : i32
    return %c0_i32, %c0_i32_0 : i32, i32
  }
  func.func @transform_7(%arg0: i32) -> (i32, i32) {
    %c0_i32 = arith.constant 0 : i32
    %c0_i32_0 = arith.constant 0 : i32
    return %arg0, %c0_i32 : i32, i32
  }
}

</mosaic_0001>

<bundles_post_ra>
// kernel: tpu_custom_call.1
= control target key start
LH: loop header
LB: loop body
LE: loop exit
PB: predicated region body
PF: predicated region fallthrough
CT: control target
= control target key end

     0   :  { %12 = vsyncpa [#allocation3], 0  ;;  %s4067_s0 = inlined_call_operand.hbm [shape: f32[8,768], index: 0, kind: input, shape index: {}]   ;;  %s4068_s1 = inlined_call_operand.hbm [shape: bf16[768,512], index: 1, kind: input, shape index: {}]   ;;  %s4069_s2 = inlined_call_operand.vmem [shape: f32[1,512], index: 2, kind: input, shape index: {}]   ;;  %s4070_s3 = inlined_call_operand.hbm [shape: bf16[512,512], index: 3, kind: input, shape index: {}]   ;;  %s4071_s4 = inlined_call_operand.vmem [shape: f32[1,512], index: 4, kind: input, shape index: {}]   ;;  %s4072_s5 = inlined_call_operand.hbm [shape: bf16[512,128], index: 5, kind: input, shape index: {}]   ;;  %s4073_s6 = inlined_call_operand.vmem [shape: f32[1,128], index: 6, kind: input, shape index: {}]   ;;  %s4074_s7 = inlined_call_operand.hbm [shape: f32[8,128], index: 7, kind: output, shape index: {}]  }
   0x1   :  { %13 = vsyncpa [#allocation6], 0 }
   0x2   :  { %14 = vsyncpa [#allocation9], 0 }
   0x3   :  { %15 = vsyncpa [#allocation4], 0  ;;  %s3912_s24 = smov [#allocation5]   ;;  %s3794_s28 = scalar_lea.hbm %s4068_s1, 24576 }
   0x4   :  { %s31_s25 = sshll.u32 %s3912_s24, 4  ;;  %p3795_p0 = scmp.ne.s32.totalorder %s4068_s1, %s3794_s28  ;;  %s32_s25 = int_to_ptr.vmem [resolvable:$true] %s31_s25 }
   0x5   :  { %p3798_p1 = scmp.lt.u32.totalorder %s3794_s28, %s4068_s1 }
   0x7   :  { %p3800_p2 = pnand %p3798_p1, %p3795_p0 }
   0x9   :  { %3803 = shalt.err (!%p3800_p2)
}
   0xa   :  { %s3804_s10 = scalar_lea.vmem %s32_s25, 24576  ;;  %p3809_p4 = scmp.lt.s32.totalorder %s32_s25, %s32_s25 }
   0xb   :  { %p3805_p3 = scmp.ne.s32.totalorder %s32_s25, %s3804_s10  ;;  %p3810_p5 = scmp.lt.s32.totalorder %s3804_s10, %s3804_s10 }
   0xd   :  { %p3811_p6 = por %p3810_p5, %p3809_p4 }
   0xf   :  { %p3812_p7 = pnand %p3811_p6, %p3805_p3 }
  0x11   :  { %3815 = shalt.err (!%p3812_p7)
}
  0x12   :  { %s3913_s11 = smov 256   ;;  %s3914_s12 = smov 16  }
  0x13   :  { %37 = dma.hbm_to_vmem [thread:$0]  %s4068_s1, 24576, %s32_s25, [#allocation6], %s3913_s11, %s3913_s11, %s3914_s12  }
  0x14   :  { %s3915_s15 = smov [#allocation2]   ;;  %s3916_s17 = smov [#allocation7]  }
  0x15   :  { %s22_s16 = sshll.u32 %s3915_s15, 4  ;;  %s45_s18 = sshll.u32 %s3916_s17, 4  ;;  %s23_s16 = int_to_ptr.vmem [resolvable:$true] %s22_s16  ;;  %s46_s18 = int_to_ptr.vmem [resolvable:$true] %s45_s18 }
  0x16   :  { %s3816_s21 = scalar_lea.hbm %s4067_s0, 768 }
  0x17   :  { %p3817_p8 = scmp.ne.s32.totalorder %s4067_s0, %s3816_s21  ;;  %p3820_p9 = scmp.lt.u32.totalorder %s3816_s21, %s4067_s0 }
  0x19   :  { %p3822_p10 = pnand %p3820_p9, %p3817_p8 }
  0x1b   :  { %3825 = shalt.err (!%p3822_p10)
}
  0x1c   :  { %s3826_s1 = scalar_lea.vmem %s23_s16, 768  ;;  %p3831_p12 = scmp.lt.s32.totalorder %s23_s16, %s23_s16 }
  0x1d   :  { %p3827_p11 = scmp.ne.s32.totalorder %s23_s16, %s3826_s1  ;;  %p3832_p13 = scmp.lt.s32.totalorder %s3826_s1, %s3826_s1 }
  0x1f   :  { %p3833_p0 = por %p3832_p13, %p3831_p12 }
  0x21   :  { %p3834_p1 = pnand %p3833_p0, %p3827_p11 }
  0x23   :  { %3837 = shalt.err (!%p3834_p1)
}
  0x24   :  { %25 = dma.hbm_to_vmem [thread:$0]  %s4067_s0, 768, %s23_s16, [#allocation3]  }
  0x25   :  { %s3838_s30 = scalar_lea.hbm %s4070_s3, 16384 }
  0x26   :  { %p3839_p2 = scmp.ne.s32.totalorder %s4070_s3, %s3838_s30  ;;  %p3842_p3 = scmp.lt.u32.totalorder %s3838_s30, %s4070_s3 }
  0x28   :  { %p3844_p4 = pnand %p3842_p3, %p3839_p2 }
  0x2a   :  { %3847 = shalt.err (!%p3844_p4)
}
  0x2b   :  { %s3848_s14 = scalar_lea.vmem %s46_s18, 16384  ;;  %p3853_p6 = scmp.lt.s32.totalorder %s46_s18, %s46_s18 }
  0x2c   :  { %p3849_p5 = scmp.ne.s32.totalorder %s46_s18, %s3848_s14  ;;  %p3854_p7 = scmp.lt.s32.totalorder %s3848_s14, %s3848_s14 }
  0x2e   :  { %p3855_p8 = por %p3854_p7, %p3853_p6 }
  0x30   :  { %p3856_p9 = pnand %p3855_p8, %p3849_p5 }
  0x32   :  { %3859 = shalt.err (!%p3856_p9)
}
  0x33   :  { %51 = dma.hbm_to_vmem [thread:$0]  %s4070_s3, 16384, %s46_s18, [#allocation6], %s3913_s11, %s3913_s11, %s3914_s12  }
  0x34   :  { %s3917_s16 = smov [#allocation8]   ;;  %s3860_s21 = scalar_lea.hbm %s4072_s5, 4096 }
  0x35   :  { %s59_s17 = sshll.u32 %s3917_s16, 4  ;;  %p3861_p10 = scmp.ne.s32.totalorder %s4072_s5, %s3860_s21  ;;  %s60_s17 = int_to_ptr.vmem [resolvable:$true] %s59_s17 }
  0x36   :  { %p3864_p11 = scmp.lt.u32.totalorder %s3860_s21, %s4072_s5 }
  0x38   :  { %p3866_p12 = pnand %p3864_p11, %p3861_p10 }
  0x3a   :  { %3869 = shalt.err (!%p3866_p12)
}
  0x3b   :  { %s3870_s1 = scalar_lea.vmem %s60_s17, 4096  ;;  %p3875_p0 = scmp.lt.s32.totalorder %s60_s17, %s60_s17 }
  0x3c   :  { %p3871_p13 = scmp.ne.s32.totalorder %s60_s17, %s3870_s1  ;;  %p3876_p1 = scmp.lt.s32.totalorder %s3870_s1, %s3870_s1 }
  0x3e   :  { %p3877_p2 = por %p3876_p1, %p3875_p0 }
  0x40   :  { %p3878_p3 = pnand %p3877_p2, %p3871_p13 }
  0x42   :  { %3881 = shalt.err (!%p3878_p3)
}
  0x43   :  { %s3918_s3 = smov 64   ;;  %s3919_s11 = smov 4  }
  0x44   :  { %65 = dma.hbm_to_vmem [thread:$0]  %s4072_s5, 4096, %s60_s17, [#allocation9], %s3918_s3, %s3918_s3, %s3919_s11  }
  0x45   :  { %3904 = dma.done.wait [#allocation3], 768  }
  0x46   :  { %3905 = vsyncadd [#allocation3], 4294966528 }
  0x47   :  { %3906 = dma.done.wait [#allocation6], 40960  }
  0x48   :  { %3907 = vsyncadd [#allocation6], 4294926336 }
  0x49   :  { %3908 = dma.done.wait [#allocation9], 4096  }
  0x4a   :  { %3909 = vsyncadd [#allocation9], 4294963200  ;;  %v3282_v0 = vld [vmem:[#allocation5 + $0x4] ss:$16 sps:$4 sm:$0xff]   ;;  %v3284_v1 = vld [vmem:[#allocation5 + $0xc] ss:$16 sps:$4 sm:$0xff]  }
  0x4b   :  { %1267 = vmatprep.subr.bf16.mxu0 %v3282_v0  ;;  %v3286_v2 = vld [vmem:[#allocation5] ss:$16 sps:$4 sm:$0xff]   ;;  %v3287_v3 = vld [vmem:[#allocation5 + $0x8] ss:$16 sps:$4 sm:$0xff]   ;;  %1390 = vmatprep.subr.bf16.mxu1 %v3284_v1  ;;  %v3288_v4 = vld [vmem:[#allocation5 + $0x24] ss:$16 sps:$4 sm:$0xff]  }
  0x4c   :  { %1268 = vmatpush1.bf16.msra.mxu0 %v3286_v2  ;;  %1391 = vmatpush1.bf16.msra.mxu1 %v3287_v3  ;;  %v3290_v5 = vld [vmem:[#allocation5 + $0x2c] ss:$16 sps:$4 sm:$0xff]   ;;  %v3292_v6 = vld [vmem:[#allocation5 + $0x20] ss:$16 sps:$4 sm:$0xff]   ;;  %v3293_v7 = vld [vmem:[#allocation5 + $0x28] ss:$16 sps:$4 sm:$0xff]  }
  0x4d   :  { %1269 = vmatprep.subr.bf16.mxu0 %v3288_v4  ;;  %1392 = vmatprep.subr.bf16.mxu1 %v3290_v5  ;;  %v3294_v8 = vld [vmem:[#allocation5 + $0x44] ss:$16 sps:$4 sm:$0xff]   ;;  %v3296_v9 = vld [vmem:[#allocation5 + $0x4c] ss:$16 sps:$4 sm:$0xff]   ;;  %v3298_v10 = vld [vmem:[#allocation5 + $0x40] ss:$16 sps:$4 sm:$0xff]  }
  0x4e   :  { %v3299_v11 = vld [vmem:[#allocation5 + $0x48] ss:$16 sps:$4 sm:$0xff]   ;;  %v3300_v12 = vld [vmem:[#allocation5 + $0x64] ss:$16 sps:$4 sm:$0xff]   ;;  %v3302_v13 = vld [vmem:[#allocation5 + $0x6c] ss:$16 sps:$4 sm:$0xff]  }
  0x4f   :  { %v3304_v14 = vld [vmem:[#allocation5 + $0x60] ss:$16 sps:$4 sm:$0xff]   ;;  %v3305_v15 = vld [vmem:[#allocation5 + $0x68] ss:$16 sps:$4 sm:$0xff]   ;;  %v3306_v16 = vld [vmem:[#allocation5 + $0x84] ss:$16 sps:$4 sm:$0xff]  }
  0x50   :  { %1270 = vmatpush1.bf16.msra.mxu0 %v3292_v6  ;;  %1393 = vmatpush1.bf16.msra.mxu1 %v3293_v7  ;;  %v3308_v17 = vld [vmem:[#allocation5 + $0x8c] ss:$16 sps:$4 sm:$0xff]   ;;  %v3310_v18 = vld [vmem:[#allocation5 + $0x80] ss:$16 sps:$4 sm:$0xff]   ;;  %v3311_v19 = vld [vmem:[#allocation5 + $0x88] ss:$16 sps:$4 sm:$0xff]  }
  0x51   :  { %1271 = vmatprep.subr.bf16.mxu0 %v3294_v8  ;;  %1394 = vmatprep.subr.bf16.mxu1 %v3296_v9  ;;  %v3312_v20 = vld [vmem:[#allocation5 + $0xa4] ss:$16 sps:$4 sm:$0xff]   ;;  %v3314_v21 = vld [vmem:[#allocation5 + $0xac] ss:$16 sps:$4 sm:$0xff]   ;;  %v3316_v22 = vld [vmem:[#allocation5 + $0xa0] ss:$16 sps:$4 sm:$0xff]  }
  0x52   :  { %v3317_v23 = vld [vmem:[#allocation5 + $0xa8] ss:$16 sps:$4 sm:$0xff]   ;;  %v3318_v24 = vld [vmem:[#allocation5 + $0xc4] ss:$16 sps:$4 sm:$0xff]   ;;  %v3320_v25 = vld [vmem:[#allocation5 + $0xcc] ss:$16 sps:$4 sm:$0xff]  }
  0x53   :  { %v3322_v26 = vld [vmem:[#allocation5 + $0xc0] ss:$16 sps:$4 sm:$0xff]   ;;  %v3323_v27 = vld [vmem:[#allocation5 + $0xc8] ss:$16 sps:$4 sm:$0xff]   ;;  %v3324_v28 = vld [vmem:[#allocation5 + $0xe4] ss:$16 sps:$4 sm:$0xff]  }
  0x54   :  { %1272 = vmatpush1.bf16.msra.mxu0 %v3298_v10  ;;  %1395 = vmatpush1.bf16.msra.mxu1 %v3299_v11  ;;  %v3326_v29 = vld [vmem:[#allocation5 + $0xec] ss:$16 sps:$4 sm:$0xff]   ;;  %v3328_v30 = vld [vmem:[#allocation5 + $0xe0] ss:$16 sps:$4 sm:$0xff]   ;;  %v3329_v31 = vld [vmem:[#allocation5 + $0xe8] ss:$16 sps:$4 sm:$0xff]  }
  0x55   :  { %1273 = vmatprep.subr.bf16.mxu0 %v3300_v12  ;;  %1396 = vmatprep.subr.bf16.mxu1 %v3302_v13  ;;  %v3330_v32 = vld [vmem:[#allocation5 + $0x104] ss:$16 sps:$4 sm:$0xff]   ;;  %v3332_v33 = vld [vmem:[#allocation5 + $0x10c] ss:$16 sps:$4 sm:$0xff]   ;;  %v3334_v34 = vld [vmem:[#allocation5 + $0x100] ss:$16 sps:$4 sm:$0xff]  }
  0x56   :  { %v3335_v35 = vld [vmem:[#allocation5 + $0x108] ss:$16 sps:$4 sm:$0xff]   ;;  %v3336_v36 = vld [vmem:[#allocation5 + $0x124] ss:$16 sps:$4 sm:$0xff]   ;;  %v3338_v37 = vld [vmem:[#allocation5 + $0x12c] ss:$16 sps:$4 sm:$0xff]  }
  0x57   :  { %v3340_v38 = vld [vmem:[#allocation5 + $0x120] ss:$16 sps:$4 sm:$0xff]   ;;  %v3341_v39 = vld [vmem:[#allocation5 + $0x128] ss:$16 sps:$4 sm:$0xff]   ;;  %v3342_v40 = vld [vmem:[#allocation5 + $0x144] ss:$16 sps:$4 sm:$0xff]  }
  0x58   :  { %1274 = vmatpush1.bf16.msra.mxu0 %v3304_v14  ;;  %1397 = vmatpush1.bf16.msra.mxu1 %v3305_v15  ;;  %v3344_v41 = vld [vmem:[#allocation5 + $0x14c] ss:$16 sps:$4 sm:$0xff]   ;;  %v3346_v42 = vld [vmem:[#allocation5 + $0x140] ss:$16 sps:$4 sm:$0xff]   ;;  %v3347_v43 = vld [vmem:[#allocation5 + $0x148] ss:$16 sps:$4 sm:$0xff]  }
  0x59   :  { %1275 = vmatprep.subr.bf16.mxu0 %v3306_v16  ;;  %1398 = vmatprep.subr.bf16.mxu1 %v3308_v17  ;;  %v3348_v44 = vld [vmem:[#allocation5 + $0x164] ss:$16 sps:$4 sm:$0xff]   ;;  %v3350_v45 = vld [vmem:[#allocation5 + $0x16c] ss:$16 sps:$4 sm:$0xff]   ;;  %v3352_v47 = vld [vmem:[#allocation5 + $0x160] ss:$16 sps:$4 sm:$0xff]  }
  0x5a   :  { %v82_v46 = vld [vmem:[#allocation2 + $0x8] sm:$0xff]  ;;  %v3354_v50 = vld [vmem:[#allocation5 + $0x184] ss:$16 sps:$4 sm:$0xff]   ;;  %v3358_v52 = vld [vmem:[#allocation5 + $0x180] ss:$16 sps:$4 sm:$0xff]   ;;  %s3920_s29 = smov [#allocation10]  }
  0x5b   :  { %v88_v48 = vpack.c.bf16 %v82_v46, %v82_v46  ;;  %v3353_v49 = vld [vmem:[#allocation5 + $0x168] ss:$16 sps:$4 sm:$0xff]   ;;  %v3356_v51 = vld [vmem:[#allocation5 + $0x18c] ss:$16 sps:$4 sm:$0xff]   ;;  %v3360_v54 = vld [vmem:[#allocation5 + $0x1a4] ss:$16 sps:$4 sm:$0xff]  }
  0x5c   :  { %1276 = vmatpush1.bf16.msra.mxu0 %v3310_v18  ;;  %1399 = vmatpush1.bf16.msra.mxu1 %v3311_v19  ;;  %v3359_v53 = vld [vmem:[#allocation5 + $0x188] ss:$16 sps:$4 sm:$0xff]   ;;  %v3362_v55 = vld [vmem:[#allocation5 + $0x1ac] ss:$16 sps:$4 sm:$0xff]   ;;  %v3364_v56 = vld [vmem:[#allocation5 + $0x1a0] ss:$16 sps:$4 sm:$0xff]  }
  0x5d   :  { %1277 = vmatprep.subr.bf16.mxu0 %v3312_v20  ;;  %1400 = vmatprep.subr.bf16.mxu1 %v3314_v21  ;;  %v3365_v57 = vld [vmem:[#allocation5 + $0x1a8] ss:$16 sps:$4 sm:$0xff]   ;;  %v3366_v58 = vld [vmem:[#allocation5 + $0x1c4] ss:$16 sps:$4 sm:$0xff]   ;;  %v3368_v59 = vld [vmem:[#allocation5 + $0x1cc] ss:$16 sps:$4 sm:$0xff]  }
  0x5e   :  { %1299 = vmatprep.mubr.bf16.mxu0 %v88_v48  ;;  %1422 = vmatprep.mubr.bf16.mxu1 %v88_v48  ;;  %v3370_v60 = vld [vmem:[#allocation5 + $0x1c0] ss:$16 sps:$4 sm:$0xff]   ;;  %v3371_v61 = vld [vmem:[#allocation5 + $0x1c8] ss:$16 sps:$4 sm:$0xff]   ;;  %v3372_v62 = vld [vmem:[#allocation5 + $0x1e4] ss:$16 sps:$4 sm:$0xff]  }
  0x5f   :  { %v3374_v63 = vld [vmem:[#allocation5 + $0x1ec] ss:$16 sps:$4 sm:$0xff]   ;;  %v3376_v0 = vld [vmem:[#allocation5 + $0x1e0] ss:$16 sps:$4 sm:$0xff]   ;;  %v3377_v1 = vld [vmem:[#allocation5 + $0x1e8] ss:$16 sps:$4 sm:$0xff]  }
  0x60   :  { %1278 = vmatpush1.bf16.msra.mxu0 %v3316_v22  ;;  %1401 = vmatpush1.bf16.msra.mxu1 %v3317_v23  ;;  %v81_v2 = vld [vmem:[#allocation2] sm:$0xff]  ;;  %v3383_v4 = vld [vmem:[#allocation5 + $0x20c] ss:$16 sps:$4 sm:$0xff]   ;;  %v3381_v7 = vld [vmem:[#allocation5 + $0x208] ss:$16 sps:$4 sm:$0xff]   ;;  %s2833_s30 = sshll.u32 %s3920_s29, 4  ;;  %s2834_s30 = int_to_ptr.vmem [resolvable:$true] %s2833_s30 }
  0x61   :  { %1279 = vmatprep.subr.bf16.mxu0 %v3318_v24  ;;  %1402 = vmatprep.subr.bf16.mxu1 %v3320_v25  ;;  %v3380_v3 = vld [vmem:[#allocation5 + $0x204] ss:$16 sps:$4 sm:$0xff]   ;;  %v87_v5 = vpack.c.bf16 %v81_v2, %v81_v2  ;;  %v3378_v6 = vld [vmem:[#allocation5 + $0x200] ss:$16 sps:$4 sm:$0xff]   ;;  %v3389_v9 = vld [vmem:[#allocation5 + $0x22c] ss:$16 sps:$4 sm:$0xff]   ;;  %p3887_p5 = scmp.lt.s32.totalorder %s2834_s30, %s2834_s30 }
  0x62   :  { %v3386_v8 = vld [vmem:[#allocation5 + $0x224] ss:$16 sps:$4 sm:$0xff]   ;;  %v3384_v10 = vld [vmem:[#allocation5 + $0x220] ss:$16 sps:$4 sm:$0xff]   ;;  %v3387_v11 = vld [vmem:[#allocation5 + $0x228] ss:$16 sps:$4 sm:$0xff]  }
  0x63   :  { %v3392_v12 = vld [vmem:[#allocation5 + $0x244] ss:$16 sps:$4 sm:$0xff]   ;;  %v3395_v13 = vld [vmem:[#allocation5 + $0x24c] ss:$16 sps:$4 sm:$0xff]   ;;  %v3390_v14 = vld [vmem:[#allocation5 + $0x240] ss:$16 sps:$4 sm:$0xff]  }
  0x64   :  { %1280 = vmatpush1.bf16.msra.mxu0 %v3322_v26  ;;  %1403 = vmatpush1.bf16.msra.mxu1 %v3323_v27  ;;  %v3393_v15 = vld [vmem:[#allocation5 + $0x248] ss:$16 sps:$4 sm:$0xff]   ;;  %v3398_v16 = vld [vmem:[#allocation5 + $0x264] ss:$16 sps:$4 sm:$0xff]   ;;  %v3401_v17 = vld [vmem:[#allocation5 + $0x26c] ss:$16 sps:$4 sm:$0xff]  }
  0x65   :  { %1281 = vmatprep.subr.bf16.mxu0 %v3324_v28  ;;  %1404 = vmatprep.subr.bf16.mxu1 %v3326_v29  ;;  %v3396_v18 = vld [vmem:[#allocation5 + $0x260] ss:$16 sps:$4 sm:$0xff]   ;;  %v3399_v19 = vld [vmem:[#allocation5 + $0x268] ss:$16 sps:$4 sm:$0xff]   ;;  %v3404_v20 = vld [vmem:[#allocation5 + $0x284] ss:$16 sps:$4 sm:$0xff]  }
  0x66   :  { %v3407_v21 = vld [vmem:[#allocation5 + $0x28c] ss:$16 sps:$4 sm:$0xff]   ;;  %v3402_v22 = vld [vmem:[#allocation5 + $0x280] ss:$16 sps:$4 sm:$0xff]   ;;  %v3405_v23 = vld [vmem:[#allocation5 + $0x288] ss:$16 sps:$4 sm:$0xff]  }
  0x67   :  { %v3410_v24 = vld [vmem:[#allocation5 + $0x2a4] ss:$16 sps:$4 sm:$0xff]   ;;  %v3413_v25 = vld [vmem:[#allocation5 + $0x2ac] ss:$16 sps:$4 sm:$0xff]   ;;  %v3408_v26 = vld [vmem:[#allocation5 + $0x2a0] ss:$16 sps:$4 sm:$0xff]  }
  0x68   :  { %1282 = vmatpush1.bf16.msra.mxu0 %v3328_v30  ;;  %1405 = vmatpush1.bf16.msra.mxu1 %v3329_v31  ;;  %v3411_v27 = vld [vmem:[#allocation5 + $0x2a8] ss:$16 sps:$4 sm:$0xff]   ;;  %v3416_v28 = vld [vmem:[#allocation5 + $0x2c4] ss:$16 sps:$4 sm:$0xff]   ;;  %v3419_v29 = vld [vmem:[#allocation5 + $0x2cc] ss:$16 sps:$4 sm:$0xff]  }
  0x69   :  { %1283 = vmatprep.subr.bf16.mxu0 %v3330_v32  ;;  %1406 = vmatprep.subr.bf16.mxu1 %v3332_v33  ;;  %v84_v30 = vld [vmem:[#allocation2 + $0x18] sm:$0xff]  ;;  %v3414_v31 = vld [vmem:[#allocation5 + $0x2c0] ss:$16 sps:$4 sm:$0xff]   ;;  %v3440_v46 = vld [vmem:[#allocation5 + $0x344] ss:$16 sps:$4 sm:$0xff]   ;;  %s3882_s8 = scalar_lea.vmem %s2834_s30, 128 }
  0x6a   :  { %v90_v32 = vpack.c.bf16 %v84_v30, %v84_v30  ;;  %v3417_v33 = vld [vmem:[#allocation5 + $0x2c8] ss:$16 sps:$4 sm:$0xff]   ;;  %v3438_v48 = vld [vmem:[#allocation5 + $0x340] ss:$16 sps:$4 sm:$0xff]   ;;  %v3470_v2 = vld [vmem:[#allocation5 + $0x3e4] ss:$16 sps:$4 sm:$0xff]   ;;  %p3883_p4 = scmp.ne.s32.totalorder %s2834_s30, %s3882_s8  ;;  %p3888_p6 = scmp.lt.s32.totalorder %s3882_s8, %s3882_s8 }
  0x6b   :  { %v3506_v30 = vld [vmem:[#allocation5 + $0x4a4] ss:$16 sps:$4 sm:$0xff]  }
  0x6c   :  { %1284 = vmatpush1.bf16.msra.mxu0 %v3334_v34  ;;  %1407 = vmatpush1.bf16.msra.mxu1 %v3335_v35  ;;  %v3422_v34 = vld [vmem:[#allocation5 + $0x2e4] ss:$16 sps:$4 sm:$0xff]   ;;  %v3425_v35 = vld [vmem:[#allocation5 + $0x2ec] ss:$16 sps:$4 sm:$0xff]   ;;  %p3889_p7 = por %p3888_p6, %p3887_p5 }
  0x6d   :  { %1285 = vmatprep.subr.bf16.mxu0 %v3336_v36  ;;  %1408 = vmatprep.subr.bf16.mxu1 %v3338_v37  ;;  %v3420_v36 = vld [vmem:[#allocation5 + $0x2e0] ss:$16 sps:$4 sm:$0xff]   ;;  %v3423_v37 = vld [vmem:[#allocation5 + $0x2e8] ss:$16 sps:$4 sm:$0xff]  }
  0x6e   :  { %p3890_p8 = pnand %p3889_p7, %p3883_p4 }
  0x70   :  { %1286 = vmatpush1.bf16.msra.mxu0 %v3340_v38  ;;  %1409 = vmatpush1.bf16.msra.mxu1 %v3341_v39  ;;  %v3428_v38 = vld [vmem:[#allocation5 + $0x304] ss:$16 sps:$4 sm:$0xff]   ;;  %v3431_v39 = vld [vmem:[#allocation5 + $0x30c] ss:$16 sps:$4 sm:$0xff]  }
  0x71   :  { %1287 = vmatprep.subr.bf16.mxu0 %v3342_v40  ;;  %1410 = vmatprep.subr.bf16.mxu1 %v3344_v41  ;;  %v3426_v40 = vld [vmem:[#allocation5 + $0x300] ss:$16 sps:$4 sm:$0xff]   ;;  %v3429_v41 = vld [vmem:[#allocation5 + $0x308] ss:$16 sps:$4 sm:$0xff]  }
  0x74   :  { %1288 = vmatpush1.bf16.msra.mxu0 %v3346_v42  ;;  %1411 = vmatpush1.bf16.msra.mxu1 %v3347_v43  ;;  %v3434_v42 = vld [vmem:[#allocation5 + $0x324] ss:$16 sps:$4 sm:$0xff]   ;;  %v3437_v43 = vld [vmem:[#allocation5 + $0x32c] ss:$16 sps:$4 sm:$0xff]  }
  0x75   :  { %1289 = vmatprep.subr.bf16.mxu0 %v3348_v44  ;;  %1412 = vmatprep.subr.bf16.mxu1 %v3350_v45  ;;  %v3432_v44 = vld [vmem:[#allocation5 + $0x320] ss:$16 sps:$4 sm:$0xff]   ;;  %v3435_v45 = vld [vmem:[#allocation5 + $0x328] ss:$16 sps:$4 sm:$0xff]  }
  0x78   :  { %1290 = vmatpush1.bf16.msra.mxu0 %v3352_v47  ;;  %1413 = vmatpush1.bf16.msra.mxu1 %v3353_v49  ;;  %v3443_v47 = vld [vmem:[#allocation5 + $0x34c] ss:$16 sps:$4 sm:$0xff]   ;;  %v3441_v49 = vld [vmem:[#allocation5 + $0x348] ss:$16 sps:$4 sm:$0xff]  }
  0x79   :  { %1291 = vmatprep.subr.bf16.mxu0 %v3354_v50  ;;  %1414 = vmatprep.subr.bf16.mxu1 %v3356_v51  ;;  %v3446_v50 = vld [vmem:[#allocation5 + $0x364] ss:$16 sps:$4 sm:$0xff]   ;;  %v3449_v51 = vld [vmem:[#allocation5 + $0x36c] ss:$16 sps:$4 sm:$0xff]  }
  0x7c   :  { %1292 = vmatpush1.bf16.msra.mxu0 %v3358_v52  ;;  %1415 = vmatpush1.bf16.msra.mxu1 %v3359_v53  ;;  %v3444_v52 = vld [vmem:[#allocation5 + $0x360] ss:$16 sps:$4 sm:$0xff]   ;;  %v3447_v53 = vld [vmem:[#allocation5 + $0x368] ss:$16 sps:$4 sm:$0xff]  }
  0x7d   :  { %1293 = vmatprep.subr.bf16.mxu0 %v3360_v54  ;;  %1416 = vmatprep.subr.bf16.mxu1 %v3362_v55  ;;  %v3452_v54 = vld [vmem:[#allocation5 + $0x384] ss:$16 sps:$4 sm:$0xff]   ;;  %v3455_v55 = vld [vmem:[#allocation5 + $0x38c] ss:$16 sps:$4 sm:$0xff]  }
  0x80   :  { %1294 = vmatpush1.bf16.msra.mxu0 %v3364_v56  ;;  %1417 = vmatpush1.bf16.msra.mxu1 %v3365_v57  ;;  %v3450_v56 = vld [vmem:[#allocation5 + $0x380] ss:$16 sps:$4 sm:$0xff]   ;;  %v3453_v57 = vld [vmem:[#allocation5 + $0x388] ss:$16 sps:$4 sm:$0xff]  }
  0x81   :  { %1295 = vmatprep.subr.bf16.mxu0 %v3366_v58  ;;  %1418 = vmatprep.subr.bf16.mxu1 %v3368_v59  ;;  %v3458_v58 = vld [vmem:[#allocation5 + $0x3a4] ss:$16 sps:$4 sm:$0xff]   ;;  %v3461_v59 = vld [vmem:[#allocation5 + $0x3ac] ss:$16 sps:$4 sm:$0xff]  }
  0x84   :  { %1296 = vmatpush1.bf16.msra.mxu0 %v3370_v60  ;;  %1419 = vmatpush1.bf16.msra.mxu1 %v3371_v61  ;;  %v3456_v60 = vld [vmem:[#allocation5 + $0x3a0] ss:$16 sps:$4 sm:$0xff]   ;;  %v3459_v61 = vld [vmem:[#allocation5 + $0x3a8] ss:$16 sps:$4 sm:$0xff]  }
  0x85   :  { %1297 = vmatprep.subr.bf16.mxu0 %v3372_v62  ;;  %1420 = vmatprep.subr.bf16.mxu1 %v3374_v63  ;;  %v3464_v62 = vld [vmem:[#allocation5 + $0x3c4] ss:$16 sps:$4 sm:$0xff]   ;;  %v3467_v63 = vld [vmem:[#allocation5 + $0x3cc] ss:$16 sps:$4 sm:$0xff]  }
  0x88   :  { %1298 = vmatpush1.bf16.msra.mxu0 %v3376_v0  ;;  %1421 = vmatpush1.bf16.msra.mxu1 %v3377_v1  ;;  %v3462_v0 = vld [vmem:[#allocation5 + $0x3c0] ss:$16 sps:$4 sm:$0xff]   ;;  %v3465_v1 = vld [vmem:[#allocation5 + $0x3c8] ss:$16 sps:$4 sm:$0xff]  }
  0x89   :  { %1308 = vmatprep.subr.bf16.mxu0 %v3380_v3  ;;  %1431 = vmatprep.subr.bf16.mxu1 %v3383_v4  ;;  %v3473_v3 = vld [vmem:[#allocation5 + $0x3ec] ss:$16 sps:$4 sm:$0xff]   ;;  %v3468_v4 = vld [vmem:[#allocation5 + $0x3e0] ss:$16 sps:$4 sm:$0xff]  }
  0x8b   :  { %1300 = vmatmul.mubr.bf16.vlgmr.msra.gmra.mrb[0].mxu0 %v87_v5  ;;  %1423 = vmatmul.mubr.bf16.vlgmr.msra.gmra.mrb[0].mxu1 %v87_v5  ;;  %v3471_v5 = vld [vmem:[#allocation5 + $0x3e8] ss:$16 sps:$4 sm:$0xff]  }
  0x8c   :  { %1309 = vmatpush1.bf16.msra.mxu0 %v3378_v6  ;;  %1432 = vmatpush1.bf16.msra.mxu1 %v3381_v7  ;;  %v3476_v6 = vld [vmem:[#allocation5 + $0x404] ss:$16 sps:$4 sm:$0xff]  }
  0x8d   :  { %1310 = vmatprep.subr.bf16.mxu0 %v3386_v8  ;;  %1433 = vmatprep.subr.bf16.mxu1 %v3389_v9  ;;  %v83_v7 = vld [vmem:[#allocation2 + $0x10] sm:$0xff]  ;;  %v3479_v8 = vld [vmem:[#allocation5 + $0x40c] ss:$16 sps:$4 sm:$0xff]  }
  0x8e   :  { %1340 = vmatprep.mubr.bf16.mxu0 %v90_v32  ;;  %1463 = vmatprep.mubr.bf16.mxu1 %v90_v32  ;;  %v3474_v9 = vld [vmem:[#allocation5 + $0x400] ss:$16 sps:$4 sm:$0xff]  }
  0x8f   :  { %v3504_v32 = vld [vmem:[#allocation5 + $0x4a0] ss:$16 sps:$4 sm:$0xff]  }
  0x90   :  { %1311 = vmatpush1.bf16.msra.mxu0 %v3384_v10  ;;  %1434 = vmatpush1.bf16.msra.mxu1 %v3387_v11  ;;  %v89_v10 = vpack.c.bf16 %v83_v7, %v83_v7  ;;  %v3477_v11 = vld [vmem:[#allocation5 + $0x408] ss:$16 sps:$4 sm:$0xff]   ;;  %v3569_v7 = vld [vmem:[#allocation5 + $0x5ec] ss:$16 sps:$4 sm:$0xff]  }
  0x91   :  { %1312 = vmatprep.subr.bf16.mxu0 %v3392_v12  ;;  %1435 = vmatprep.subr.bf16.mxu1 %v3395_v13  ;;  %v3482_v12 = vld [vmem:[#allocation5 + $0x424] ss:$16 sps:$4 sm:$0xff]   ;;  %v3485_v13 = vld [vmem:[#allocation5 + $0x42c] ss:$16 sps:$4 sm:$0xff]  }
  0x94   :  { %1313 = vmatpush1.bf16.msra.mxu0 %v3390_v14  ;;  %1436 = vmatpush1.bf16.msra.mxu1 %v3393_v15  ;;  %v86_v14 = vld [vmem:[#allocation2 + $0x28] sm:$0xff] }
  0x95   :  { %1314 = vmatprep.subr.bf16.mxu0 %v3398_v16  ;;  %1437 = vmatprep.subr.bf16.mxu1 %v3401_v17  ;;  %v92_v15 = vpack.c.bf16 %v86_v14, %v86_v14  ;;  %v3480_v16 = vld [vmem:[#allocation5 + $0x420] ss:$16 sps:$4 sm:$0xff]   ;;  %v3483_v17 = vld [vmem:[#allocation5 + $0x428] ss:$16 sps:$4 sm:$0xff]  }
  0x96   :  { %v3573_v14 = vld [vmem:[#allocation7 + $0x8] ss:$16 sps:$4 sm:$0xff]  }
  0x98   :  { %1315 = vmatpush1.bf16.msra.mxu0 %v3396_v18  ;;  %1438 = vmatpush1.bf16.msra.mxu1 %v3399_v19  ;;  %v3488_v18 = vld [vmem:[#allocation5 + $0x444] ss:$16 sps:$4 sm:$0xff]   ;;  %v3491_v19 = vld [vmem:[#allocation5 + $0x44c] ss:$16 sps:$4 sm:$0xff]  }
  0x99   :  { %1316 = vmatprep.subr.bf16.mxu0 %v3404_v20  ;;  %1439 = vmatprep.subr.bf16.mxu1 %v3407_v21  ;;  %v3486_v20 = vld [vmem:[#allocation5 + $0x440] ss:$16 sps:$4 sm:$0xff]   ;;  %v3489_v21 = vld [vmem:[#allocation5 + $0x448] ss:$16 sps:$4 sm:$0xff]  }
  0x9c   :  { %1317 = vmatpush1.bf16.msra.mxu0 %v3402_v22  ;;  %1440 = vmatpush1.bf16.msra.mxu1 %v3405_v23  ;;  %v3494_v22 = vld [vmem:[#allocation5 + $0x464] ss:$16 sps:$4 sm:$0xff]   ;;  %v3497_v23 = vld [vmem:[#allocation5 + $0x46c] ss:$16 sps:$4 sm:$0xff]  }
  0x9d   :  { %1318 = vmatprep.subr.bf16.mxu0 %v3410_v24  ;;  %1441 = vmatprep.subr.bf16.mxu1 %v3413_v25  ;;  %v3492_v24 = vld [vmem:[#allocation5 + $0x460] ss:$16 sps:$4 sm:$0xff]   ;;  %v3495_v25 = vld [vmem:[#allocation5 + $0x468] ss:$16 sps:$4 sm:$0xff]  }
  0xa0   :  { %1319 = vmatpush1.bf16.msra.mxu0 %v3408_v26  ;;  %1442 = vmatpush1.bf16.msra.mxu1 %v3411_v27  ;;  %v3500_v26 = vld [vmem:[#allocation5 + $0x484] ss:$16 sps:$4 sm:$0xff]   ;;  %v3503_v27 = vld [vmem:[#allocation5 + $0x48c] ss:$16 sps:$4 sm:$0xff]  }
  0xa1   :  { %1320 = vmatprep.subr.bf16.mxu0 %v3416_v28  ;;  %1443 = vmatprep.subr.bf16.mxu1 %v3419_v29  ;;  %v3498_v28 = vld [vmem:[#allocation5 + $0x480] ss:$16 sps:$4 sm:$0xff]   ;;  %v3501_v29 = vld [vmem:[#allocation5 + $0x488] ss:$16 sps:$4 sm:$0xff]  }
  0xa4   :  { %1321 = vmatpush1.bf16.msra.mxu0 %v3414_v31  ;;  %1444 = vmatpush1.bf16.msra.mxu1 %v3417_v33  ;;  %v3509_v31 = vld [vmem:[#allocation5 + $0x4ac] ss:$16 sps:$4 sm:$0xff]   ;;  %v3507_v33 = vld [vmem:[#allocation5 + $0x4a8] ss:$16 sps:$4 sm:$0xff]  }
  0xa5   :  { %1322 = vmatprep.subr.bf16.mxu0 %v3422_v34  ;;  %1445 = vmatprep.subr.bf16.mxu1 %v3425_v35  ;;  %v3512_v34 = vld [vmem:[#allocation5 + $0x4c4] ss:$16 sps:$4 sm:$0xff]   ;;  %v3515_v35 = vld [vmem:[#allocation5 + $0x4cc] ss:$16 sps:$4 sm:$0xff]  }
  0xa8   :  { %1323 = vmatpush1.bf16.msra.mxu0 %v3420_v36  ;;  %1446 = vmatpush1.bf16.msra.mxu1 %v3423_v37  ;;  %v3510_v36 = vld [vmem:[#allocation5 + $0x4c0] ss:$16 sps:$4 sm:$0xff]   ;;  %v3513_v37 = vld [vmem:[#allocation5 + $0x4c8] ss:$16 sps:$4 sm:$0xff]  }
  0xa9   :  { %1324 = vmatprep.subr.bf16.mxu0 %v3428_v38  ;;  %1447 = vmatprep.subr.bf16.mxu1 %v3431_v39  ;;  %v3518_v38 = vld [vmem:[#allocation5 + $0x4e4] ss:$16 sps:$4 sm:$0xff]   ;;  %v3521_v39 = vld [vmem:[#allocation5 + $0x4ec] ss:$16 sps:$4 sm:$0xff]  }
  0xac   :  { %1325 = vmatpush1.bf16.msra.mxu0 %v3426_v40  ;;  %1448 = vmatpush1.bf16.msra.mxu1 %v3429_v41  ;;  %v3516_v40 = vld [vmem:[#allocation5 + $0x4e0] ss:$16 sps:$4 sm:$0xff]   ;;  %v3519_v41 = vld [vmem:[#allocation5 + $0x4e8] ss:$16 sps:$4 sm:$0xff]  }
  0xad   :  { %1326 = vmatprep.subr.bf16.mxu0 %v3434_v42  ;;  %1449 = vmatprep.subr.bf16.mxu1 %v3437_v43  ;;  %v3524_v42 = vld [vmem:[#allocation5 + $0x504] ss:$16 sps:$4 sm:$0xff]   ;;  %v3527_v43 = vld [vmem:[#allocation5 + $0x50c] ss:$16 sps:$4 sm:$0xff]  }
  0xb0   :  { %1327 = vmatpush1.bf16.msra.mxu0 %v3432_v44  ;;  %1450 = vmatpush1.bf16.msra.mxu1 %v3435_v45  ;;  %v3522_v44 = vld [vmem:[#allocation5 + $0x500] ss:$16 sps:$4 sm:$0xff]   ;;  %v3525_v45 = vld [vmem:[#allocation5 + $0x508] ss:$16 sps:$4 sm:$0xff]  }
  0xb1   :  { %1328 = vmatprep.subr.bf16.mxu0 %v3440_v46  ;;  %1451 = vmatprep.subr.bf16.mxu1 %v3443_v47  ;;  %v3530_v46 = vld [vmem:[#allocation5 + $0x524] ss:$16 sps:$4 sm:$0xff]   ;;  %v3533_v47 = vld [vmem:[#allocation5 + $0x52c] ss:$16 sps:$4 sm:$0xff]  }
  0xb4   :  { %1329 = vmatpush1.bf16.msra.mxu0 %v3438_v48  ;;  %1452 = vmatpush1.bf16.msra.mxu1 %v3441_v49  ;;  %v3528_v48 = vld [vmem:[#allocation5 + $0x520] ss:$16 sps:$4 sm:$0xff]   ;;  %v3531_v49 = vld [vmem:[#allocation5 + $0x528] ss:$16 sps:$4 sm:$0xff]  }
  0xb5   :  { %1330 = vmatprep.subr.bf16.mxu0 %v3446_v50  ;;  %1453 = vmatprep.subr.bf16.mxu1 %v3449_v51  ;;  %v3536_v50 = vld [vmem:[#allocation5 + $0x544] ss:$16 sps:$4 sm:$0xff]   ;;  %v3539_v51 = vld [vmem:[#allocation5 + $0x54c] ss:$16 sps:$4 sm:$0xff]  }
  0xb8   :  { %1331 = vmatpush1.bf16.msra.mxu0 %v3444_v52  ;;  %1454 = vmatpush1.bf16.msra.mxu1 %v3447_v53  ;;  %v3534_v52 = vld [vmem:[#allocation5 + $0x540] ss:$16 sps:$4 sm:$0xff]   ;;  %v3537_v53 = vld [vmem:[#allocation5 + $0x548] ss:$16 sps:$4 sm:$0xff]  }
  0xb9   :  { %1332 = vmatprep.subr.bf16.mxu0 %v3452_v54  ;;  %1455 = vmatprep.subr.bf16.mxu1 %v3455_v55  ;;  %v3542_v54 = vld [vmem:[#allocation5 + $0x564] ss:$16 sps:$4 sm:$0xff]   ;;  %v3545_v55 = vld [vmem:[#allocation5 + $0x56c] ss:$16 sps:$4 sm:$0xff]  }
  0xbc   :  { %1333 = vmatpush1.bf16.msra.mxu0 %v3450_v56  ;;  %1456 = vmatpush1.bf16.msra.mxu1 %v3453_v57  ;;  %v3540_v56 = vld [vmem:[#allocation5 + $0x560] ss:$16 sps:$4 sm:$0xff]   ;;  %v3543_v57 = vld [vmem:[#allocation5 + $0x568] ss:$16 sps:$4 sm:$0xff]  }
  0xbd   :  { %1334 = vmatprep.subr.bf16.mxu0 %v3458_v58  ;;  %1457 = vmatprep.subr.bf16.mxu1 %v3461_v59  ;;  %v3548_v58 = vld [vmem:[#allocation5 + $0x584] ss:$16 sps:$4 sm:$0xff]   ;;  %v3551_v59 = vld [vmem:[#allocation5 + $0x58c] ss:$16 sps:$4 sm:$0xff]  }
  0xc0   :  { %1335 = vmatpush1.bf16.msra.mxu0 %v3456_v60  ;;  %1458 = vmatpush1.bf16.msra.mxu1 %v3459_v61  ;;  %v3546_v60 = vld [vmem:[#allocation5 + $0x580] ss:$16 sps:$4 sm:$0xff]   ;;  %v3549_v61 = vld [vmem:[#allocation5 + $0x588] ss:$16 sps:$4 sm:$0xff]  }
  0xc1   :  { %1336 = vmatprep.subr.bf16.mxu0 %v3464_v62  ;;  %1459 = vmatprep.subr.bf16.mxu1 %v3467_v63  ;;  %v3554_v62 = vld [vmem:[#allocation5 + $0x5a4] ss:$16 sps:$4 sm:$0xff]   ;;  %v3557_v63 = vld [vmem:[#allocation5 + $0x5ac] ss:$16 sps:$4 sm:$0xff]  }
  0xc4   :  { %1337 = vmatpush1.bf16.msra.mxu0 %v3462_v0  ;;  %1460 = vmatpush1.bf16.msra.mxu1 %v3465_v1  ;;  %v3552_v0 = vld [vmem:[#allocation5 + $0x5a0] ss:$16 sps:$4 sm:$0xff]   ;;  %v3555_v1 = vld [vmem:[#allocation5 + $0x5a8] ss:$16 sps:$4 sm:$0xff]  }
  0xc5   :  { %1338 = vmatprep.subr.bf16.mxu0 %v3470_v2  ;;  %1461 = vmatprep.subr.bf16.mxu1 %v3473_v3  ;;  %v3560_v2 = vld [vmem:[#allocation5 + $0x5c4] ss:$16 sps:$4 sm:$0xff]   ;;  %v3563_v3 = vld [vmem:[#allocation5 + $0x5cc] ss:$16 sps:$4 sm:$0xff]  }
  0xc8   :  { %1339 = vmatpush1.bf16.msra.mxu0 %v3468_v4  ;;  %1462 = vmatpush1.bf16.msra.mxu1 %v3471_v5  ;;  %v3558_v4 = vld [vmem:[#allocation5 + $0x5c0] ss:$16 sps:$4 sm:$0xff]   ;;  %v3561_v5 = vld [vmem:[#allocation5 + $0x5c8] ss:$16 sps:$4 sm:$0xff]  }
  0xc9   :  { %1349 = vmatprep.subr.bf16.mxu0 %v3476_v6  ;;  %1472 = vmatprep.subr.bf16.mxu1 %v3479_v8  ;;  %v3566_v6 = vld [vmem:[#allocation5 + $0x5e4] ss:$16 sps:$4 sm:$0xff]   ;;  %v3564_v8 = vld [vmem:[#allocation5 + $0x5e0] ss:$16 sps:$4 sm:$0xff]  }
  0xcb   :  { %1341 = vmatmul.mubr.bf16.vlgmr.msra.gmra.mrb[0].mxu0 %v89_v10  ;;  %1464 = vmatmul.mubr.bf16.vlgmr.msra.gmra.mrb[0].mxu1 %v89_v10  ;;  %v85_v10 = vld [vmem:[#allocation2 + $0x20] sm:$0xff] }
  0xcc   :  { %1350 = vmatpush1.bf16.msra.mxu0 %v3474_v9  ;;  %1473 = vmatpush1.bf16.msra.mxu1 %v3477_v11  ;;  %v3567_v9 = vld [vmem:[#allocation5 + $0x5e8] ss:$16 sps:$4 sm:$0xff]   ;;  %v3572_v11 = vld [vmem:[#allocation7 + $0x4] ss:$16 sps:$4 sm:$0xff]  }
  0xcd   :  { %1351 = vmatprep.subr.bf16.mxu0 %v3482_v12  ;;  %1474 = vmatprep.subr.bf16.mxu1 %v3485_v13  ;;  %v3575_v12 = vld [vmem:[#allocation7 + $0xc] ss:$16 sps:$4 sm:$0xff]   ;;  %v3570_v13 = vld [vmem:[#allocation7] ss:$16 sps:$4 sm:$0xff]  }
  0xce   :  { %1381 = vmatprep.mubr.bf16.mxu0 %v92_v15  ;;  %1504 = vmatprep.mubr.bf16.mxu1 %v92_v15  ;;  %v91_v15 = vpack.c.bf16 %v85_v10, %v85_v10  ;;  %v3660_v10 = vld [vmem:[#allocation7 + $0x1e0] ss:$16 sps:$4 sm:$0xff]  }
  0xd0   :  { %1352 = vmatpush1.bf16.msra.mxu0 %v3480_v16  ;;  %1475 = vmatpush1.bf16.msra.mxu1 %v3483_v17  ;;  %v3578_v16 = vld [vmem:[#allocation7 + $0x24] ss:$16 sps:$4 sm:$0xff]   ;;  %v3581_v17 = vld [vmem:[#allocation7 + $0x2c] ss:$16 sps:$4 sm:$0xff]  }
  0xd1   :  { %1353 = vmatprep.subr.bf16.mxu0 %v3488_v18  ;;  %1476 = vmatprep.subr.bf16.mxu1 %v3491_v19  ;;  %v3576_v18 = vld [vmem:[#allocation7 + $0x20] ss:$16 sps:$4 sm:$0xff]   ;;  %v3579_v19 = vld [vmem:[#allocation7 + $0x28] ss:$16 sps:$4 sm:$0xff]  }
  0xd4   :  { %1354 = vmatpush1.bf16.msra.mxu0 %v3486_v20  ;;  %1477 = vmatpush1.bf16.msra.mxu1 %v3489_v21  ;;  %v3584_v20 = vld [vmem:[#allocation7 + $0x44] ss:$16 sps:$4 sm:$0xff]   ;;  %v3587_v21 = vld [vmem:[#allocation7 + $0x4c] ss:$16 sps:$4 sm:$0xff]  }
  0xd5   :  { %1355 = vmatprep.subr.bf16.mxu0 %v3494_v22  ;;  %1478 = vmatprep.subr.bf16.mxu1 %v3497_v23  ;;  %v3582_v22 = vld [vmem:[#allocation7 + $0x40] ss:$16 sps:$4 sm:$0xff]   ;;  %v3585_v23 = vld [vmem:[#allocation7 + $0x48] ss:$16 sps:$4 sm:$0xff]  }
  0xd8   :  { %1356 = vmatpush1.bf16.msra.mxu0 %v3492_v24  ;;  %1479 = vmatpush1.bf16.msra.mxu1 %v3495_v25  ;;  %v3590_v24 = vld [vmem:[#allocation7 + $0x64] ss:$16 sps:$4 sm:$0xff]   ;;  %v3593_v25 = vld [vmem:[#allocation7 + $0x6c] ss:$16 sps:$4 sm:$0xff]  }
  0xd9   :  { %1357 = vmatprep.subr.bf16.mxu0 %v3500_v26  ;;  %1480 = vmatprep.subr.bf16.mxu1 %v3503_v27  ;;  %v3588_v26 = vld [vmem:[#allocation7 + $0x60] ss:$16 sps:$4 sm:$0xff]   ;;  %v3591_v27 = vld [vmem:[#allocation7 + $0x68] ss:$16 sps:$4 sm:$0xff]  }
  0xdc   :  { %1358 = vmatpush1.bf16.msra.mxu0 %v3498_v28  ;;  %1481 = vmatpush1.bf16.msra.mxu1 %v3501_v29  ;;  %v3596_v28 = vld [vmem:[#allocation7 + $0x84] ss:$16 sps:$4 sm:$0xff]   ;;  %v3599_v29 = vld [vmem:[#allocation7 + $0x8c] ss:$16 sps:$4 sm:$0xff]  }
  0xdd   :  { %1359 = vmatprep.subr.bf16.mxu0 %v3506_v30  ;;  %1482 = vmatprep.subr.bf16.mxu1 %v3509_v31  ;;  %v3594_v30 = vld [vmem:[#allocation7 + $0x80] ss:$16 sps:$4 sm:$0xff]   ;;  %v3597_v31 = vld [vmem:[#allocation7 + $0x88] ss:$16 sps:$4 sm:$0xff]  }
  0xe0   :  { %1360 = vmatpush1.bf16.msra.mxu0 %v3504_v32  ;;  %1483 = vmatpush1.bf16.msra.mxu1 %v3507_v33  ;;  %v3602_v32 = vld [vmem:[#allocation7 + $0xa4] ss:$16 sps:$4 sm:$0xff]   ;;  %v3605_v33 = vld [vmem:[#allocation7 + $0xac] ss:$16 sps:$4 sm:$0xff]  }
  0xe1   :  { %1361 = vmatprep.subr.bf16.mxu0 %v3512_v34  ;;  %1484 = vmatprep.subr.bf16.mxu1 %v3515_v35  ;;  %v3600_v34 = vld [vmem:[#allocation7 + $0xa0] ss:$16 sps:$4 sm:$0xff]   ;;  %v3603_v35 = vld [vmem:[#allocation7 + $0xa8] ss:$16 sps:$4 sm:$0xff]  }
  0xe4   :  { %1362 = vmatpush1.bf16.msra.mxu0 %v3510_v36  ;;  %1485 = vmatpush1.bf16.msra.mxu1 %v3513_v37  ;;  %v3608_v36 = vld [vmem:[#allocation7 + $0xc4] ss:$16 sps:$4 sm:$0xff]   ;;  %v3611_v37 = vld [vmem:[#allocation7 + $0xcc] ss:$16 sps:$4 sm:$0xff]  }
  0xe5   :  { %1363 = vmatprep.subr.bf16.mxu0 %v3518_v38  ;;  %1486 = vmatprep.subr.bf16.mxu1 %v3521_v39  ;;  %v3606_v38 = vld [vmem:[#allocation7 + $0xc0] ss:$16 sps:$4 sm:$0xff]   ;;  %v3609_v39 = vld [vmem:[#allocation7 + $0xc8] ss:$16 sps:$4 sm:$0xff]  }
  0xe8   :  { %1364 = vmatpush1.bf16.msra.mxu0 %v3516_v40  ;;  %1487 = vmatpush1.bf16.msra.mxu1 %v3519_v41  ;;  %v3614_v40 = vld [vmem:[#allocation7 + $0xe4] ss:$16 sps:$4 sm:$0xff]   ;;  %v3617_v41 = vld [vmem:[#allocation7 + $0xec] ss:$16 sps:$4 sm:$0xff]  }
  0xe9   :  { %1365 = vmatprep.subr.bf16.mxu0 %v3524_v42  ;;  %1488 = vmatprep.subr.bf16.mxu1 %v3527_v43  ;;  %v3612_v42 = vld [vmem:[#allocation7 + $0xe0] ss:$16 sps:$4 sm:$0xff]   ;;  %v3615_v43 = vld [vmem:[#allocation7 + $0xe8] ss:$16 sps:$4 sm:$0xff]  }
  0xec   :  { %1366 = vmatpush1.bf16.msra.mxu0 %v3522_v44  ;;  %1489 = vmatpush1.bf16.msra.mxu1 %v3525_v45  ;;  %v3620_v44 = vld [vmem:[#allocation7 + $0x104] ss:$16 sps:$4 sm:$0xff]   ;;  %v3623_v45 = vld [vmem:[#allocation7 + $0x10c] ss:$16 sps:$4 sm:$0xff]  }
  0xed   :  { %1367 = vmatprep.subr.bf16.mxu0 %v3530_v46  ;;  %1490 = vmatprep.subr.bf16.mxu1 %v3533_v47  ;;  %v3618_v46 = vld [vmem:[#allocation7 + $0x100] ss:$16 sps:$4 sm:$0xff]   ;;  %v3621_v47 = vld [vmem:[#allocation7 + $0x108] ss:$16 sps:$4 sm:$0xff]  }
  0xf0   :  { %1368 = vmatpush1.bf16.msra.mxu0 %v3528_v48  ;;  %1491 = vmatpush1.bf16.msra.mxu1 %v3531_v49  ;;  %v3626_v48 = vld [vmem:[#allocation7 + $0x124] ss:$16 sps:$4 sm:$0xff]   ;;  %v3629_v49 = vld [vmem:[#allocation7 + $0x12c] ss:$16 sps:$4 sm:$0xff]  }
  0xf1   :  { %1369 = vmatprep.subr.bf16.mxu0 %v3536_v50  ;;  %1492 = vmatprep.subr.bf16.mxu1 %v3539_v51  ;;  %v3624_v50 = vld [vmem:[#allocation7 + $0x120] ss:$16 sps:$4 sm:$0xff]   ;;  %v3627_v51 = vld [vmem:[#allocation7 + $0x128] ss:$16 sps:$4 sm:$0xff]  }
  0xf4   :  { %1370 = vmatpush1.bf16.msra.mxu0 %v3534_v52  ;;  %1493 = vmatpush1.bf16.msra.mxu1 %v3537_v53  ;;  %v3632_v52 = vld [vmem:[#allocation7 + $0x144] ss:$16 sps:$4 sm:$0xff]   ;;  %v3635_v53 = vld [vmem:[#allocation7 + $0x14c] ss:$16 sps:$4 sm:$0xff]  }
  0xf5   :  { %1371 = vmatprep.subr.bf16.mxu0 %v3542_v54  ;;  %1494 = vmatprep.subr.bf16.mxu1 %v3545_v55  ;;  %v3630_v54 = vld [vmem:[#allocation7 + $0x140] ss:$16 sps:$4 sm:$0xff]   ;;  %v3633_v55 = vld [vmem:[#allocation7 + $0x148] ss:$16 sps:$4 sm:$0xff]  }
  0xf8   :  { %1372 = vmatpush1.bf16.msra.mxu0 %v3540_v56  ;;  %1495 = vmatpush1.bf16.msra.mxu1 %v3543_v57  ;;  %v3638_v56 = vld [vmem:[#allocation7 + $0x164] ss:$16 sps:$4 sm:$0xff]   ;;  %v3641_v57 = vld [vmem:[#allocation7 + $0x16c] ss:$16 sps:$4 sm:$0xff]  }
  0xf9   :  { %1373 = vmatprep.subr.bf16.mxu0 %v3548_v58  ;;  %1496 = vmatprep.subr.bf16.mxu1 %v3551_v59  ;;  %v3636_v58 = vld [vmem:[#allocation7 + $0x160] ss:$16 sps:$4 sm:$0xff]   ;;  %v3639_v59 = vld [vmem:[#allocation7 + $0x168] ss:$16 sps:$4 sm:$0xff]  }
  0xfc   :  { %1374 = vmatpush1.bf16.msra.mxu0 %v3546_v60  ;;  %1497 = vmatpush1.bf16.msra.mxu1 %v3549_v61  ;;  %v3644_v60 = vld [vmem:[#allocation7 + $0x184] ss:$16 sps:$4 sm:$0xff]   ;;  %v3647_v61 = vld [vmem:[#allocation7 + $0x18c] ss:$16 sps:$4 sm:$0xff]  }
  0xfd   :  { %1375 = vmatprep.subr.bf16.mxu0 %v3554_v62  ;;  %1498 = vmatprep.subr.bf16.mxu1 %v3557_v63  ;;  %v3642_v62 = vld [vmem:[#allocation7 + $0x180] ss:$16 sps:$4 sm:$0xff]   ;;  %v3645_v63 = vld [vmem:[#allocation7 + $0x188] ss:$16 sps:$4 sm:$0xff]  }
 0x100   :  { %1376 = vmatpush1.bf16.msra.mxu0 %v3552_v0  ;;  %1499 = vmatpush1.bf16.msra.mxu1 %v3555_v1  ;;  %v3650_v0 = vld [vmem:[#allocation7 + $0x1a4] ss:$16 sps:$4 sm:$0xff]   ;;  %v3653_v1 = vld [vmem:[#allocation7 + $0x1ac] ss:$16 sps:$4 sm:$0xff]  }
 0x101   :  { %1377 = vmatprep.subr.bf16.mxu0 %v3560_v2  ;;  %1500 = vmatprep.subr.bf16.mxu1 %v3563_v3  ;;  %v3648_v2 = vld [vmem:[#allocation7 + $0x1a0] ss:$16 sps:$4 sm:$0xff]   ;;  %v3651_v3 = vld [vmem:[#allocation7 + $0x1a8] ss:$16 sps:$4 sm:$0xff]  }
 0x104   :  { %1378 = vmatpush1.bf16.msra.mxu0 %v3558_v4  ;;  %1501 = vmatpush1.bf16.msra.mxu1 %v3561_v5  ;;  %v3656_v4 = vld [vmem:[#allocation7 + $0x1c4] ss:$16 sps:$4 sm:$0xff]   ;;  %v3659_v5 = vld [vmem:[#allocation7 + $0x1cc] ss:$16 sps:$4 sm:$0xff]  }
 0x105   :  { %1379 = vmatprep.subr.bf16.mxu0 %v3566_v6  ;;  %1502 = vmatprep.subr.bf16.mxu1 %v3569_v7  ;;  %v3654_v6 = vld [vmem:[#allocation7 + $0x1c0] ss:$16 sps:$4 sm:$0xff]   ;;  %v3657_v7 = vld [vmem:[#allocation7 + $0x1c8] ss:$16 sps:$4 sm:$0xff]  }
 0x108   :  { %1380 = vmatpush1.bf16.msra.mxu0 %v3564_v8  ;;  %1503 = vmatpush1.bf16.msra.mxu1 %v3567_v9  ;;  %v3662_v8 = vld [vmem:[#allocation7 + $0x1e4] ss:$16 sps:$4 sm:$0xff]   ;;  %v3665_v9 = vld [vmem:[#allocation7 + $0x1ec] ss:$16 sps:$4 sm:$0xff]  }
 0x109   :  { %2311 = vmatprep.subr.bf16.mxu0 %v3572_v11  ;;  %2393 = vmatprep.subr.bf16.mxu1 %v3575_v12  ;;  %v3663_v11 = vld [vmem:[#allocation7 + $0x1e8] ss:$16 sps:$4 sm:$0xff]   ;;  %v3668_v12 = vld [vmem:[#allocation7 + $0x204] ss:$16 sps:$4 sm:$0xff]  }
 0x10b   :  { %1382 = vmatmul.mubr.bf16.vlgmr.msra.gmra.mrb[0].mxu0 %v91_v15  ;;  %1505 = vmatmul.mubr.bf16.vlgmr.msra.gmra.mrb[0].mxu1 %v91_v15 }
 0x10c   :  { %2312 = vmatpush1.bf16.msra.mxu0 %v3570_v13  ;;  %2394 = vmatpush1.bf16.msra.mxu1 %v3573_v14  ;;  %v3671_v13 = vld [vmem:[#allocation7 + $0x20c] ss:$16 sps:$4 sm:$0xff]   ;;  %v287_v14 = vlaneseq }
 0x10d   :  { %2313 = vmatprep.subr.bf16.mxu0 %v3578_v16  ;;  %2395 = vmatprep.subr.bf16.mxu1 %v3581_v17  ;;  %v4021_v17 = vld [vmem:[%s4069_s2] sm:$0xf] }
 0x10e   :  { %v4015_v15 = vshrl.u32 %v287_v14, 7  ;;  %v3728_v14 = vld [vmem:[#allocation7 + $0x344] ss:$16 sps:$4 sm:$0xff]  }
 0x110   :  { %2314 = vmatpush1.bf16.msra.mxu0 %v3576_v18  ;;  %2396 = vmatpush1.bf16.msra.mxu1 %v3579_v19  ;;  %v289_v16 = vsub.s32 0, %v4015_v15  ;;  %v293_v18 = vsub.s32 1, %v4015_v15  ;;  %v301_v19 = vsub.s32 3, %v4015_v15 }
 0x111   :  { %2315 = vmatprep.subr.bf16.mxu0 %v3584_v20  ;;  %2397 = vmatprep.subr.bf16.mxu1 %v3587_v21 }
 0x112   :  { %v290_v20 = vrot.slane %v4021_v17, %v289_v16  ;;  %v294_v21 = vrot.slane %v4021_v17, %v293_v18 }
 0x114   :  { %2316 = vmatpush1.bf16.msra.mxu0 %v3582_v22  ;;  %2398 = vmatpush1.bf16.msra.mxu1 %v3585_v23  ;;  %v302_v22 = vrot.slane %v4021_v17, %v301_v19 }
 0x115   :  { %2317 = vmatprep.subr.bf16.mxu0 %v3590_v24  ;;  %2399 = vmatprep.subr.bf16.mxu1 %v3593_v25 }
 0x118   :  { %2318 = vmatpush1.bf16.msra.mxu0 %v3588_v26  ;;  %2400 = vmatpush1.bf16.msra.mxu1 %v3591_v27 }
 0x119   :  { %2319 = vmatprep.subr.bf16.mxu0 %v3596_v28  ;;  %2401 = vmatprep.subr.bf16.mxu1 %v3599_v29 }
 0x11c   :  { %2320 = vmatpush1.bf16.msra.mxu0 %v3594_v30  ;;  %2402 = vmatpush1.bf16.msra.mxu1 %v3597_v31 }
 0x11d   :  { %2321 = vmatprep.subr.bf16.mxu0 %v3602_v32  ;;  %2403 = vmatprep.subr.bf16.mxu1 %v3605_v33 }
 0x120   :  { %2322 = vmatpush1.bf16.msra.mxu0 %v3600_v34  ;;  %2404 = vmatpush1.bf16.msra.mxu1 %v3603_v35 }
 0x121   :  { %2323 = vmatprep.subr.bf16.mxu0 %v3608_v36  ;;  %2405 = vmatprep.subr.bf16.mxu1 %v3611_v37 }
 0x124   :  { %2324 = vmatpush1.bf16.msra.mxu0 %v3606_v38  ;;  %2406 = vmatpush1.bf16.msra.mxu1 %v3609_v39  ;;  %v3666_v38 = vld [vmem:[#allocation7 + $0x200] ss:$16 sps:$4 sm:$0xff]   ;;  %v3669_v39 = vld [vmem:[#allocation7 + $0x208] ss:$16 sps:$4 sm:$0xff]  }
 0x125   :  { %2325 = vmatprep.subr.bf16.mxu0 %v3614_v40  ;;  %2407 = vmatprep.subr.bf16.mxu1 %v3617_v41  ;;  %v3674_v41 = vld [vmem:[#allocation7 + $0x224] ss:$16 sps:$4 sm:$0xff]  }
 0x128   :  { %2326 = vmatpush1.bf16.msra.mxu0 %v3612_v42  ;;  %2408 = vmatpush1.bf16.msra.mxu1 %v3615_v43  ;;  %v3677_v42 = vld [vmem:[#allocation7 + $0x22c] ss:$16 sps:$4 sm:$0xff]  }
 0x129   :  { %2327 = vmatprep.subr.bf16.mxu0 %v3620_v44  ;;  %2409 = vmatprep.subr.bf16.mxu1 %v3623_v45  ;;  %v3672_v44 = vld [vmem:[#allocation7 + $0x220] ss:$16 sps:$4 sm:$0xff]   ;;  %v3675_v45 = vld [vmem:[#allocation7 + $0x228] ss:$16 sps:$4 sm:$0xff]  }
 0x12c   :  { %2328 = vmatpush1.bf16.msra.mxu0 %v3618_v46  ;;  %2410 = vmatpush1.bf16.msra.mxu1 %v3621_v47  ;;  %v3680_v46 = vld [vmem:[#allocation7 + $0x244] ss:$16 sps:$4 sm:$0xff]   ;;  %v3683_v47 = vld [vmem:[#allocation7 + $0x24c] ss:$16 sps:$4 sm:$0xff]  }
 0x12d   :  { %2329 = vmatprep.subr.bf16.mxu0 %v3626_v48  ;;  %2411 = vmatprep.subr.bf16.mxu1 %v3629_v49  ;;  %v3678_v48 = vld [vmem:[#allocation7 + $0x240] ss:$16 sps:$4 sm:$0xff]   ;;  %v3681_v49 = vld [vmem:[#allocation7 + $0x248] ss:$16 sps:$4 sm:$0xff]  }
 0x130   :  { %2330 = vmatpush1.bf16.msra.mxu0 %v3624_v50  ;;  %2412 = vmatpush1.bf16.msra.mxu1 %v3627_v51  ;;  %v3686_v50 = vld [vmem:[#allocation7 + $0x264] ss:$16 sps:$4 sm:$0xff]   ;;  %v3689_v51 = vld [vmem:[#allocation7 + $0x26c] ss:$16 sps:$4 sm:$0xff]  }
 0x131   :  { %2331 = vmatprep.subr.bf16.mxu0 %v3632_v52  ;;  %2413 = vmatprep.subr.bf16.mxu1 %v3635_v53  ;;  %v3684_v52 = vld [vmem:[#allocation7 + $0x260] ss:$16 sps:$4 sm:$0xff]   ;;  %v3687_v53 = vld [vmem:[#allocation7 + $0x268] ss:$16 sps:$4 sm:$0xff]  }
 0x134   :  { %2332 = vmatpush1.bf16.msra.mxu0 %v3630_v54  ;;  %2414 = vmatpush1.bf16.msra.mxu1 %v3633_v55  ;;  %v3692_v54 = vld [vmem:[#allocation7 + $0x284] ss:$16 sps:$4 sm:$0xff]   ;;  %v3695_v55 = vld [vmem:[#allocation7 + $0x28c] ss:$16 sps:$4 sm:$0xff]  }
 0x135   :  { %2333 = vmatprep.subr.bf16.mxu0 %v3638_v56  ;;  %2415 = vmatprep.subr.bf16.mxu1 %v3641_v57  ;;  %v3690_v56 = vld [vmem:[#allocation7 + $0x280] ss:$16 sps:$4 sm:$0xff]   ;;  %v3693_v57 = vld [vmem:[#allocation7 + $0x288] ss:$16 sps:$4 sm:$0xff]  }
 0x138   :  { %2334 = vmatpush1.bf16.msra.mxu0 %v3636_v58  ;;  %2416 = vmatpush1.bf16.msra.mxu1 %v3639_v59  ;;  %v3698_v58 = vld [vmem:[#allocation7 + $0x2a4] ss:$16 sps:$4 sm:$0xff]   ;;  %v3701_v59 = vld [vmem:[#allocation7 + $0x2ac] ss:$16 sps:$4 sm:$0xff]  }
 0x139   :  { %2335 = vmatprep.subr.bf16.mxu0 %v3644_v60  ;;  %2417 = vmatprep.subr.bf16.mxu1 %v3647_v61  ;;  %v3696_v60 = vld [vmem:[#allocation7 + $0x2a0] ss:$16 sps:$4 sm:$0xff]   ;;  %v3699_v61 = vld [vmem:[#allocation7 + $0x2a8] ss:$16 sps:$4 sm:$0xff]  }
 0x13c   :  { %2336 = vmatpush1.bf16.msra.mxu0 %v3642_v62  ;;  %2418 = vmatpush1.bf16.msra.mxu1 %v3645_v63  ;;  %v3704_v62 = vld [vmem:[#allocation7 + $0x2c4] ss:$16 sps:$4 sm:$0xff]   ;;  %v3707_v63 = vld [vmem:[#allocation7 + $0x2cc] ss:$16 sps:$4 sm:$0xff]  }
 0x13d   :  { %2337 = vmatprep.subr.bf16.mxu0 %v3650_v0  ;;  %2419 = vmatprep.subr.bf16.mxu1 %v3653_v1  ;;  %v3702_v0 = vld [vmem:[#allocation7 + $0x2c0] ss:$16 sps:$4 sm:$0xff]   ;;  %v3705_v1 = vld [vmem:[#allocation7 + $0x2c8] ss:$16 sps:$4 sm:$0xff]  }
 0x140   :  { %2338 = vmatpush1.bf16.msra.mxu0 %v3648_v2  ;;  %2420 = vmatpush1.bf16.msra.mxu1 %v3651_v3  ;;  %v3710_v2 = vld [vmem:[#allocation7 + $0x2e4] ss:$16 sps:$4 sm:$0xff]   ;;  %v3713_v3 = vld [vmem:[#allocation7 + $0x2ec] ss:$16 sps:$4 sm:$0xff]  }
 0x141   :  { %2339 = vmatprep.subr.bf16.mxu0 %v3656_v4  ;;  %2421 = vmatprep.subr.bf16.mxu1 %v3659_v5  ;;  %v3708_v4 = vld [vmem:[#allocation7 + $0x2e0] ss:$16 sps:$4 sm:$0xff]   ;;  %v3711_v5 = vld [vmem:[#allocation7 + $0x2e8] ss:$16 sps:$4 sm:$0xff]  }
 0x144   :  { %2340 = vmatpush1.bf16.msra.mxu0 %v3654_v6  ;;  %2422 = vmatpush1.bf16.msra.mxu1 %v3657_v7  ;;  %v3716_v6 = vld [vmem:[#allocation7 + $0x304] ss:$16 sps:$4 sm:$0xff]   ;;  %v3719_v7 = vld [vmem:[#allocation7 + $0x30c] ss:$16 sps:$4 sm:$0xff]  }
 0x145   :  { %2341 = vmatprep.subr.bf16.mxu0 %v3662_v8  ;;  %2423 = vmatprep.subr.bf16.mxu1 %v3665_v9  ;;  %v3714_v8 = vld [vmem:[#allocation7 + $0x300] ss:$16 sps:$4 sm:$0xff]   ;;  %v3717_v9 = vld [vmem:[#allocation7 + $0x308] ss:$16 sps:$4 sm:$0xff]  }
 0x148   :  { %2342 = vmatpush1.bf16.msra.mxu0 %v3660_v10  ;;  %2424 = vmatpush1.bf16.msra.mxu1 %v3663_v11  ;;  %v3722_v10 = vld [vmem:[#allocation7 + $0x324] ss:$16 sps:$4 sm:$0xff]   ;;  %v3725_v11 = vld [vmem:[#allocation7 + $0x32c] ss:$16 sps:$4 sm:$0xff]  }
 0x149   :  { %2352 = vmatprep.subr.bf16.mxu0 %v3668_v12  ;;  %2434 = vmatprep.subr.bf16.mxu1 %v3671_v13  ;;  %v3720_v12 = vld [vmem:[#allocation7 + $0x320] ss:$16 sps:$4 sm:$0xff]   ;;  %v3723_v13 = vld [vmem:[#allocation7 + $0x328] ss:$16 sps:$4 sm:$0xff]  }
 0x1de   :  { %v1383_v23 = vpop.f32.mrb[0].mxu0  ;;  %v4034_v24 = vpop.f32.mrb[0].mxu1 }
 0x1df   :  { %v3241_v25 = vadd.f32 %v1383_v23, %v290_v20  ;;  %v1385_v26 = vpop.f32.mrb[1].mxu0  ;;  %v1508_v27 = vpop.f32.mrb[1].mxu1  ;;  %v3731_v20 = vld [vmem:[#allocation7 + $0x34c] ss:$16 sps:$4 sm:$0xff]   ;;  %v3734_v23 = vld [vmem:[#allocation7 + $0x364] ss:$16 sps:$4 sm:$0xff]  }
 0x1e0   :  { %v3242_v28 = vadd.f32 %v1385_v26, %v294_v21  ;;  %v3244_v29 = vadd.f32 %v1508_v27, %v302_v22  ;;  %v1387_v30 = vpop.f32.mrb[2].mxu0  ;;  %v1510_v31 = vpop.f32.mrb[2].mxu1  ;;  %v3726_v21 = vld [vmem:[#allocation7 + $0x340] ss:$16 sps:$4 sm:$0xff]   ;;  %v3729_v22 = vld [vmem:[#allocation7 + $0x348] ss:$16 sps:$4 sm:$0xff]  }
 0x1e1   :  { %v1513_v32 = vmax.f32 %v3241_v25, 0.0  ;;  %v1388_v33 = vpop.f32.mrb[3].mxu0  ;;  %v1511_v34 = vpop.f32.mrb[3].mxu1  ;;  %v3737_v25 = vld [vmem:[#allocation7 + $0x36c] ss:$16 sps:$4 sm:$0xff]  }
 0x1e2   :  { %v1514_v35 = vmax.f32 %v3242_v28, 0.0  ;;  %v1516_v36 = vmax.f32 %v3244_v29, 0.0  ;;  %v3732_v26 = vld [vmem:[#allocation7 + $0x360] ss:$16 sps:$4 sm:$0xff]   ;;  %v3735_v27 = vld [vmem:[#allocation7 + $0x368] ss:$16 sps:$4 sm:$0xff]  }
 0x1e3   :  { %v1517_v40 = vpack.c.bf16 %v1513_v32, %v1513_v32  ;;  %v3740_v28 = vld [vmem:[#allocation7 + $0x384] ss:$16 sps:$4 sm:$0xff]   ;;  %v3743_v29 = vld [vmem:[#allocation7 + $0x38c] ss:$16 sps:$4 sm:$0xff]   ;;  %v3738_v30 = vld [vmem:[#allocation7 + $0x380] ss:$16 sps:$4 sm:$0xff]  }
 0x1e4   :  { %v1518_v37 = vpack.c.bf16 %v1514_v35, %v1514_v35  ;;  %v1520_v43 = vpack.c.bf16 %v1516_v36, %v1516_v36  ;;  %v3741_v31 = vld [vmem:[#allocation7 + $0x388] ss:$16 sps:$4 sm:$0xff]   ;;  %v297_v32 = vsub.s32 2, %v4015_v15  ;;  %v3746_v33 = vld [vmem:[#allocation7 + $0x3a4] ss:$16 sps:$4 sm:$0xff]  }
 0x1e5   :  { %v3749_v34 = vld [vmem:[#allocation7 + $0x3ac] ss:$16 sps:$4 sm:$0xff]   ;;  %v3744_v35 = vld [vmem:[#allocation7 + $0x3a0] ss:$16 sps:$4 sm:$0xff]   ;;  %v3747_v36 = vld [vmem:[#allocation7 + $0x3a8] ss:$16 sps:$4 sm:$0xff]  }
 0x1e6   :  { %2343 = vmatprep.mubr.bf16.mxu0 %v1518_v37  ;;  %2425 = vmatprep.mubr.bf16.mxu1 %v1518_v37  ;;  %v298_v37 = vrot.slane %v4021_v17, %v297_v32  ;;  %v3762_v17 = vld [vmem:[#allocation8 + $0x40] sm:$0xff]  }
 0x1e7   :  { %2344 = vmatmul.mubr.bf16.vlgmr.msra.gmra.mrb[4].mxu0 %v1517_v40  ;;  %2426 = vmatmul.mubr.bf16.vlgmr.msra.gmra.mrb[4].mxu1 %v1517_v40  ;;  %v3750_v40 = vld [vmem:[#allocation7 + $0x3c0] ss:$16 sps:$4 sm:$0xff]  }
 0x1e8   :  { %2353 = vmatpush1.bf16.msra.mxu0 %v3666_v38  ;;  %2435 = vmatpush1.bf16.msra.mxu1 %v3669_v39  ;;  %v3752_v38 = vld [vmem:[#allocation7 + $0x3c4] ss:$16 sps:$4 sm:$0xff]   ;;  %v3755_v39 = vld [vmem:[#allocation7 + $0x3cc] ss:$16 sps:$4 sm:$0xff]  }
 0x1e9   :  { %2384 = vmatprep.mubr.bf16.mxu0 %v1520_v43  ;;  %2466 = vmatprep.mubr.bf16.mxu1 %v1520_v43  ;;  %v3758_v43 = vld [vmem:[#allocation7 + $0x3e4] ss:$16 sps:$4 sm:$0xff]  }
 0x1ea   :  { %2354 = vmatprep.subr.bf16.mxu0 %v3674_v41  ;;  %2436 = vmatprep.subr.bf16.mxu1 %v3677_v42  ;;  %v3753_v41 = vld [vmem:[#allocation7 + $0x3c8] ss:$16 sps:$4 sm:$0xff]   ;;  %v3243_v42 = vadd.f32 %v4034_v24, %v298_v37 }
 0x1eb   :  { %v3766_v24 = vld [vmem:[#allocation8 + $0x48] sm:$0xff]  }
 0x1ec   :  { %2355 = vmatpush1.bf16.msra.mxu0 %v3672_v44  ;;  %2437 = vmatpush1.bf16.msra.mxu1 %v3675_v45  ;;  %v3761_v44 = vld [vmem:[#allocation7 + $0x3ec] ss:$16 sps:$4 sm:$0xff]   ;;  %v3756_v45 = vld [vmem:[#allocation7 + $0x3e0] ss:$16 sps:$4 sm:$0xff]  }
 0x1ed   :  { %2356 = vmatprep.subr.bf16.mxu0 %v3680_v46  ;;  %2438 = vmatprep.subr.bf16.mxu1 %v3683_v47  ;;  %v3759_v46 = vld [vmem:[#allocation7 + $0x3e8] ss:$16 sps:$4 sm:$0xff]   ;;  %v1515_v47 = vmax.f32 %v3243_v42, 0.0 }
 0x1f0   :  { %2357 = vmatpush1.bf16.msra.mxu0 %v3678_v48  ;;  %2439 = vmatpush1.bf16.msra.mxu1 %v3681_v49  ;;  %v3763_v48 = vld [vmem:[#allocation8 + $0xc0] sm:$0xff]  }
 0x1f1   :  { %2358 = vmatprep.subr.bf16.mxu0 %v3686_v50  ;;  %2440 = vmatprep.subr.bf16.mxu1 %v3689_v51  ;;  %v3764_v49 = vld [vmem:[#allocation8] sm:$0xff]   ;;  %v1519_v51 = vpack.c.bf16 %v1515_v47, %v1515_v47 }
 0x1f2   :  { %v3765_v50 = vld [vmem:[#allocation8 + $0x80] sm:$0xff]  }
 0x1f4   :  { %2359 = vmatpush1.bf16.msra.mxu0 %v3684_v52  ;;  %2441 = vmatpush1.bf16.msra.mxu1 %v3687_v53  ;;  %v3767_v52 = vld [vmem:[#allocation8 + $0xc8] sm:$0xff]  }
 0x1f5   :  { %2360 = vmatprep.subr.bf16.mxu0 %v3692_v54  ;;  %2442 = vmatprep.subr.bf16.mxu1 %v3695_v55  ;;  %v3768_v53 = vld [vmem:[#allocation8 + $0x8] sm:$0xff]   ;;  %v3770_v55 = vld [vmem:[#allocation8 + $0x50] sm:$0xff]  }
 0x1f6   :  { %v3769_v54 = vld [vmem:[#allocation8 + $0x88] sm:$0xff]  }
 0x1f8   :  { %2361 = vmatpush1.bf16.msra.mxu0 %v3690_v56  ;;  %2443 = vmatpush1.bf16.msra.mxu1 %v3693_v57  ;;  %v3771_v56 = vld [vmem:[#allocation8 + $0xd0] sm:$0xff]  }
 0x1f9   :  { %2362 = vmatprep.subr.bf16.mxu0 %v3698_v58  ;;  %2444 = vmatprep.subr.bf16.mxu1 %v3701_v59  ;;  %v3772_v57 = vld [vmem:[#allocation8 + $0x10] sm:$0xff]   ;;  %v3774_v59 = vld [vmem:[#allocation8 + $0x58] sm:$0xff]  }
 0x1fa   :  { %v3773_v58 = vld [vmem:[#allocation8 + $0x90] sm:$0xff]  }
 0x1fc   :  { %2363 = vmatpush1.bf16.msra.mxu0 %v3696_v60  ;;  %2445 = vmatpush1.bf16.msra.mxu1 %v3699_v61  ;;  %v3775_v60 = vld [vmem:[#allocation8 + $0xd8] sm:$0xff]  }
 0x1fd   :  { %2364 = vmatprep.subr.bf16.mxu0 %v3704_v62  ;;  %2446 = vmatprep.subr.bf16.mxu1 %v3707_v63  ;;  %v3776_v61 = vld [vmem:[#allocation8 + $0x18] sm:$0xff]   ;;  %v3778_v63 = vld [vmem:[#allocation8 + $0x60] sm:$0xff]  }
 0x1fe   :  { %v3777_v62 = vld [vmem:[#allocation8 + $0x98] sm:$0xff]  }
 0x200   :  { %2365 = vmatpush1.bf16.msra.mxu0 %v3702_v0  ;;  %2447 = vmatpush1.bf16.msra.mxu1 %v3705_v1  ;;  %v3779_v0 = vld [vmem:[#allocation8 + $0xe0] sm:$0xff]  }
 0x201   :  { %2366 = vmatprep.subr.bf16.mxu0 %v3710_v2  ;;  %2448 = vmatprep.subr.bf16.mxu1 %v3713_v3  ;;  %v3780_v1 = vld [vmem:[#allocation8 + $0x20] sm:$0xff]   ;;  %v3782_v3 = vld [vmem:[#allocation8 + $0x68] sm:$0xff]  }
 0x202   :  { %v3781_v2 = vld [vmem:[#allocation8 + $0xa0] sm:$0xff]  }
 0x204   :  { %2367 = vmatpush1.bf16.msra.mxu0 %v3708_v4  ;;  %2449 = vmatpush1.bf16.msra.mxu1 %v3711_v5  ;;  %v3783_v4 = vld [vmem:[#allocation8 + $0xe8] sm:$0xff]  }
 0x205   :  { %2368 = vmatprep.subr.bf16.mxu0 %v3716_v6  ;;  %2450 = vmatprep.subr.bf16.mxu1 %v3719_v7  ;;  %v3784_v5 = vld [vmem:[#allocation8 + $0x28] sm:$0xff]   ;;  %v3786_v7 = vld [vmem:[#allocation8 + $0x70] sm:$0xff]  }
 0x206   :  { %v3785_v6 = vld [vmem:[#allocation8 + $0xa8] sm:$0xff]  }
 0x208   :  { %2369 = vmatpush1.bf16.msra.mxu0 %v3714_v8  ;;  %2451 = vmatpush1.bf16.msra.mxu1 %v3717_v9  ;;  %v3787_v8 = vld [vmem:[#allocation8 + $0xf0] sm:$0xff]  }
 0x209   :  { %2370 = vmatprep.subr.bf16.mxu0 %v3722_v10  ;;  %2452 = vmatprep.subr.bf16.mxu1 %v3725_v11  ;;  %v3788_v9 = vld [vmem:[#allocation8 + $0x30] sm:$0xff]   ;;  %v3790_v11 = vld [vmem:[#allocation8 + $0x78] sm:$0xff]  }
 0x20a   :  { %v3789_v10 = vld [vmem:[#allocation8 + $0xb0] sm:$0xff]  }
 0x20c   :  { %2371 = vmatpush1.bf16.msra.mxu0 %v3720_v12  ;;  %2453 = vmatpush1.bf16.msra.mxu1 %v3723_v13  ;;  %v3791_v12 = vld [vmem:[#allocation8 + $0xf8] sm:$0xff]  }
 0x20d   :  { %2372 = vmatprep.subr.bf16.mxu0 %v3728_v14  ;;  %2454 = vmatprep.subr.bf16.mxu1 %v3731_v20  ;;  %v3792_v13 = vld [vmem:[#allocation8 + $0x38] sm:$0xff]   ;;  %v1649_v20 = vld [vmem:[%s4071_s4] sm:$0xf] }
 0x20e   :  { %v3793_v14 = vld [vmem:[#allocation8 + $0xb8] sm:$0xff]  }
 0x210   :  { %2373 = vmatpush1.bf16.msra.mxu0 %v3726_v21  ;;  %2455 = vmatpush1.bf16.msra.mxu1 %v3729_v22  ;;  %v1654_v21 = vrot.slane %v1649_v20, %v289_v16  ;;  %v1662_v22 = vrot.slane %v1649_v20, %v297_v32 }
 0x211   :  { %2374 = vmatprep.subr.bf16.mxu0 %v3734_v23  ;;  %2456 = vmatprep.subr.bf16.mxu1 %v3737_v25  ;;  %v1658_v23 = vrot.slane %v1649_v20, %v293_v18  ;;  %v1666_v25 = vrot.slane %v1649_v20, %v301_v19 }
 0x214   :  { %2375 = vmatpush1.bf16.msra.mxu0 %v3732_v26  ;;  %2457 = vmatpush1.bf16.msra.mxu1 %v3735_v27 }
 0x215   :  { %2376 = vmatprep.subr.bf16.mxu0 %v3740_v28  ;;  %2458 = vmatprep.subr.bf16.mxu1 %v3743_v29 }
 0x218   :  { %2377 = vmatpush1.bf16.msra.mxu0 %v3738_v30  ;;  %2459 = vmatpush1.bf16.msra.mxu1 %v3741_v31 }
 0x219   :  { %2378 = vmatprep.subr.bf16.mxu0 %v3746_v33  ;;  %2460 = vmatprep.subr.bf16.mxu1 %v3749_v34 }
 0x21c   :  { %2379 = vmatpush1.bf16.msra.mxu0 %v3744_v35  ;;  %2461 = vmatpush1.bf16.msra.mxu1 %v3747_v36 }
 0x21d   :  { %2380 = vmatprep.subr.bf16.mxu0 %v3752_v38  ;;  %2462 = vmatprep.subr.bf16.mxu1 %v3755_v39 }
 0x220   :  { %2381 = vmatpush1.bf16.msra.mxu0 %v3750_v40  ;;  %2463 = vmatpush1.bf16.msra.mxu1 %v3753_v41 }
 0x221   :  { %2382 = vmatprep.subr.bf16.mxu0 %v3758_v43  ;;  %2464 = vmatprep.subr.bf16.mxu1 %v3761_v44  ;;  %v3164_v44 = vld [vmem:[%s4073_s6] ss:$0 sm:$0xff] }
 0x224   :  { %2383 = vmatpush1.bf16.msra.mxu0 %v3756_v45  ;;  %2465 = vmatpush1.bf16.msra.mxu1 %v3759_v46 }
 0x225   :  { %3197 = vmatprep.subr.bf16.mxu0 %v3762_v17  ;;  %3219 = vmatprep.subr.bf16.mxu1 %v3763_v48 }
 0x227   :  { %2385 = vmatmul.mubr.bf16.vlgmr.msra.gmra.mrb[4].mxu0 %v1519_v51  ;;  %2467 = vmatmul.mubr.bf16.vlgmr.msra.gmra.mrb[4].mxu1 %v1519_v51 }
 0x228   :  { %3198 = vmatpush3.bf16.msra.mxu0 %v3764_v49  ;;  %3220 = vmatpush3.bf16.msra.mxu1 %v3765_v50 }
 0x229   :  { %3199 = vmatprep.subr.bf16.mxu0 %v3766_v24  ;;  %3221 = vmatprep.subr.bf16.mxu1 %v3767_v52 }
 0x22c   :  { %3200 = vmatpush3.bf16.msra.mxu0 %v3768_v53  ;;  %3222 = vmatpush3.bf16.msra.mxu1 %v3769_v54 }
 0x22d   :  { %3201 = vmatprep.subr.bf16.mxu0 %v3770_v55  ;;  %3223 = vmatprep.subr.bf16.mxu1 %v3771_v56 }
 0x230   :  { %3202 = vmatpush3.bf16.msra.mxu0 %v3772_v57  ;;  %3224 = vmatpush3.bf16.msra.mxu1 %v3773_v58 }
 0x231   :  { %3203 = vmatprep.subr.bf16.mxu0 %v3774_v59  ;;  %3225 = vmatprep.subr.bf16.mxu1 %v3775_v60 }
 0x234   :  { %3204 = vmatpush3.bf16.msra.mxu0 %v3776_v61  ;;  %3226 = vmatpush3.bf16.msra.mxu1 %v3777_v62 }
 0x235   :  { %3205 = vmatprep.subr.bf16.mxu0 %v3778_v63  ;;  %3227 = vmatprep.subr.bf16.mxu1 %v3779_v0 }
 0x238   :  { %3206 = vmatpush3.bf16.msra.mxu0 %v3780_v1  ;;  %3228 = vmatpush3.bf16.msra.mxu1 %v3781_v2 }
 0x239   :  { %3207 = vmatprep.subr.bf16.mxu0 %v3782_v3  ;;  %3229 = vmatprep.subr.bf16.mxu1 %v3783_v4 }
 0x23c   :  { %3208 = vmatpush3.bf16.msra.mxu0 %v3784_v5  ;;  %3230 = vmatpush3.bf16.msra.mxu1 %v3785_v6 }
 0x23d   :  { %3209 = vmatprep.subr.bf16.mxu0 %v3786_v7  ;;  %3231 = vmatprep.subr.bf16.mxu1 %v3787_v8 }
 0x240   :  { %3210 = vmatpush3.bf16.msra.mxu0 %v3788_v9  ;;  %3232 = vmatpush3.bf16.msra.mxu1 %v3789_v10 }
 0x241   :  { %3211 = vmatprep.subr.bf16.mxu0 %v3790_v11  ;;  %3233 = vmatprep.subr.bf16.mxu1 %v3791_v12 }
 0x244   :  { %3212 = vmatpush3.bf16.msra.mxu0 %v3792_v13  ;;  %3234 = vmatpush3.bf16.msra.mxu1 %v3793_v14 }
 0x2fa   :  { %v2386_v26 = vpop.f32.mrb[4].mxu0  ;;  %v2468_v27 = vpop.f32.mrb[4].mxu1 }
 0x2fb   :  { %v3245_v28 = vadd.f32 %v2386_v26, %v1654_v21  ;;  %v3247_v29 = vadd.f32 %v2468_v27, %v1662_v22  ;;  %v2388_v30 = vpop.f32.mrb[5].mxu0  ;;  %v2470_v31 = vpop.f32.mrb[5].mxu1 }
 0x2fc   :  { %v3246_v33 = vadd.f32 %v2388_v30, %v1658_v23  ;;  %v3248_v34 = vadd.f32 %v2470_v31, %v1666_v25  ;;  %v2390_v35 = vpop.f32.mrb[6].mxu0  ;;  %v2472_v36 = vpop.f32.mrb[6].mxu1 }
 0x2fd   :  { %v2475_v16 = vmax.f32 %v3245_v28, 0.0  ;;  %v2477_v37 = vmax.f32 %v3247_v29, 0.0  ;;  %v2391_v38 = vpop.f32.mrb[7].mxu0  ;;  %v2473_v32 = vpop.f32.mrb[7].mxu1 }
 0x2fe   :  { %v2476_v39 = vmax.f32 %v3246_v33, 0.0  ;;  %v2478_v40 = vmax.f32 %v3248_v34, 0.0 }
 0x2ff   :  { %v2479_v15 = vpack.c.bf16 %v2475_v16, %v2475_v16  ;;  %v2481_v19 = vpack.c.bf16 %v2477_v37, %v2477_v37 }
 0x300   :  { %v2480_v18 = vpack.c.bf16 %v2476_v39, %v2476_v39  ;;  %v2482_v41 = vpack.c.bf16 %v2478_v40, %v2478_v40 }
 0x302   :  { %2778 = vmatprep.mubr.bf16.mxu0 %v2480_v18  ;;  %2818 = vmatprep.mubr.bf16.mxu1 %v2482_v41 }
 0x303   :  { %2779 = vmatmul.mubr.bf16.vlgmr.msra.gmra.mrb[8].mxu0 %v2479_v15  ;;  %2819 = vmatmul.mubr.bf16.vlgmr.msra.gmra.mrb[8].mxu1 %v2481_v19 }
 0x3d6   :  { %v3213_v42 = vpop.f32.mrb[8].mxu0  ;;  %v3235_v43 = vpop.f32.mrb[8].mxu1 }
 0x3d7   :  { %v3214_v45 = vpop.f32.mrb[9].mxu0  ;;  %v3236_v46 = vpop.f32.mrb[9].mxu1 }
 0x3d8   :  { %v3215_v47 = vadd.f32 %v3214_v45, %v3213_v42  ;;  %v3237_v17 = vadd.f32 %v3236_v46, %v3235_v43  ;;  %v3216_v48 = vpop.f32.mrb[10].mxu0  ;;  %v3238_v49 = vpop.f32.mrb[10].mxu1 }
 0x3d9   :  { %v3217_v50 = vpop.f32.mrb[11].mxu0  ;;  %v3239_v51 = vpop.f32.mrb[11].mxu1 }
 0x3da   :  { %v2781_v24 = vadd.f32 %v3215_v47, %v3164_v44 }
 0x3dc   :  { %v2821_v52 = vadd.f32 %v3237_v17, %v2781_v24 }
 0x3de   :  { %2826 = vst [vmem:[#allocation10] sm:$0xff] %v2821_v52 }
 0x3df   :  { %3893 = shalt.err (!%p3890_p8)
}
 0x3e0   :  { %s3894_s10 = scalar_lea.hbm %s4074_s7, 128 }
 0x3e1   :  { %p3895_p9 = scmp.ne.s32.totalorder %s4074_s7, %s3894_s10  ;;  %p3898_p10 = scmp.lt.u32.totalorder %s3894_s10, %s4074_s7 }
 0x3e3   :  { %p3900_p11 = pnand %p3898_p10, %p3895_p9 }
 0x3e5   :  { %3903 = shalt.err (!%p3900_p11)
}
 0x3e6   :  { %2836 = dma.vmem_to_hbm [thread:$0]  %s2834_s30, 128, %s4074_s7, [#allocation4]  }
 0x3e7   :  { %3910 = dma.done.wait [#allocation4], 128  }
 0x3e8   :  { %3911 = vsyncadd [#allocation4], 4294967168 }
 0x3e9   :  { %2840 = vsyncpa [#allocation3], 1 }
 0x3ea   :  { %2841 = vsyncpa [#allocation6], 1 }
 0x3eb   :  { %2842 = vsyncpa [#allocation9], 1 }
 0x3ec   :  { %2843 = vsyncpa [#allocation4], 1 }

</bundles_post_ra>
